<compile_context>
chip_gen: v7x
topology: tpu7x:2x2x1
jax: 0.10.0
libtpu: 0.0.40
codegen_flags: <defaults>
</compile_context>

<pallas_src>
import math

import jax
import jax.numpy as jnp
from jax import lax
from jax.experimental import pallas as pl
from jax.experimental.pallas import tpu as pltpu

_LN_EPS = 1e-5  # torch.nn.LayerNorm default


def _encoder_layer_kernel(x_ref,
                          ln1_g_ref, ln1_b_ref,
                          wq_ref, bq_ref, wk_ref, bk_ref, wv_ref, bv_ref,
                          wo_ref, bo_ref,
                          ln2_g_ref, ln2_b_ref,
                          w1_ref, b1_ref, w2_ref, b2_ref,
                          o_ref):
    num_heads = wq_ref.shape[0]
    cdt = wq_ref.dtype          # MXU operand dtype (f32 or bf16); accumulation is f32

    x = x_ref[0]                # (S, E) f32 residual stream

    # ---------------- LayerNorm 1 ----------------
    mu = jnp.mean(x, axis=-1, keepdims=True)
    xc = x - mu
    var = jnp.mean(xc * xc, axis=-1, keepdims=True)
    x2 = xc * lax.rsqrt(var + _LN_EPS)
    x2 = x2 * ln1_g_ref[...] + ln1_b_ref[...]        # (1, E) broadcasts over (S, E)

    x2c = x2.astype(cdt)                             # cast once for all Q/K/V matmuls

    # ------------- Multi-head self-attention (mask=None, eval dropout = id) -------------
    # Heads are handled with pre-reshaped weight panels: no activation lane-slices,
    # no k.T transpose, no head concatenation (output projection folded per head).
    attn = jnp.zeros_like(x)                         # (S, E) f32 accumulator
    for h in range(num_heads):                       # static, fully unrolled
        qh = jnp.dot(x2c, wq_ref[h], preferred_element_type=jnp.float32) + bq_ref[h]
        kh = jnp.dot(x2c, wk_ref[h], preferred_element_type=jnp.float32) + bk_ref[h]
        vh = jnp.dot(x2c, wv_ref[h], preferred_element_type=jnp.float32) + bv_ref[h]

        # scores = qh @ kh.T without materializing a transpose (contract last axes).
        scores = lax.dot_general(
            qh.astype(cdt), kh.astype(cdt),
            dimension_numbers=(((1,), (1,)), ((), ())),
            preferred_element_type=jnp.float32)      # (S, S)

        # Softmax over keys, kept entirely in f32.
        scores = scores - jnp.max(scores, axis=-1, keepdims=True)
        p = jnp.exp(scores)
        p = p * pl.reciprocal(jnp.sum(p, axis=-1, keepdims=True), approx=True)

        ctx = jnp.dot(p.astype(cdt), vh.astype(cdt),
                      preferred_element_type=jnp.float32)            # (S, d)
        attn = attn + jnp.dot(ctx.astype(cdt), wo_ref[h],
                              preferred_element_type=jnp.float32)    # (S, E)

    x = x + attn + bo_ref[...]                       # residual + output-projection bias

    # ---------------- LayerNorm 2 ----------------
    mu2 = jnp.mean(x, axis=-1, keepdims=True)
    xc2 = x - mu2
    var2 = jnp.mean(xc2 * xc2, axis=-1, keepdims=True)
    y2 = xc2 * lax.rsqrt(var2 + _LN_EPS)
    y2 = y2 * ln2_g_ref[...] + ln2_b_ref[...]

    # ---------------- Feed-forward: Linear -> ReLU -> Linear ----------------
    hid = jnp.dot(y2.astype(cdt), w1_ref[...], preferred_element_type=jnp.float32) + b1_ref[...]
    hid = jnp.maximum(hid, 0.0)
    ff = jnp.dot(hid.astype(cdt), w2_ref[...], preferred_element_type=jnp.float32) + b2_ref[...]

    o_ref[0] = (x + ff).astype(o_ref.dtype)


def encoder_layer(x, params, *, num_heads, compute_dtype=jnp.float32):
    """x: [B, S, E] float32. params: dict of weights/biases (see __main__)."""
    B, S, E = x.shape
    assert E % num_heads == 0
    d = E // num_heads
    scale = 1.0 / math.sqrt(d)
    cdt = compute_dtype

    # Pre-reshape attention weights into per-head panels; fold the query scale
    # into wq/bq so the kernel never multiplies activations by the scale.
    wq_h = (params["wq"] * scale).reshape(E, num_heads, d).transpose(1, 0, 2).astype(cdt)
    wk_h = params["wk"].reshape(E, num_heads, d).transpose(1, 0, 2).astype(cdt)
    wv_h = params["wv"].reshape(E, num_heads, d).transpose(1, 0, 2).astype(cdt)
    wo_h = params["wo"].reshape(num_heads, d, E).astype(cdt)
    bq_h = (params["bq"] * scale).reshape(num_heads, 1, d).astype(jnp.float32)
    bk_h = params["bk"].reshape(num_heads, 1, d).astype(jnp.float32)
    bv_h = params["bv"].reshape(num_heads, 1, d).astype(jnp.float32)

    w1 = params["w1"].astype(cdt)
    w2 = params["w2"].astype(cdt)

    row = lambda p: p.reshape(1, -1).astype(jnp.float32)
    ln1_g, ln1_b = row(params["ln1_g"]), row(params["ln1_b"])
    ln2_g, ln2_b = row(params["ln2_g"]), row(params["ln2_b"])
    bo, b1, b2 = row(params["bo"]), row(params["b1"]), row(params["b2"])

    act_spec = pl.BlockSpec((1, S, E), lambda b: (b, 0, 0))

    def const_spec(arr):
        zeros = (0,) * arr.ndim
        return pl.BlockSpec(arr.shape, lambda b, zeros=zeros: zeros)

    inputs = (x,
              ln1_g, ln1_b,
              wq_h, bq_h, wk_h, bk_h, wv_h, bv_h,
              wo_h, bo,
              ln2_g, ln2_b,
              w1, b1, w2, b2)
    in_specs = [act_spec] + [const_spec(a) for a in inputs[1:]]

    return pl.pallas_call(
        _encoder_layer_kernel,
        out_shape=jax.ShapeDtypeStruct((B, S, E), x.dtype),
        grid_spec=pltpu.PrefetchScalarGridSpec(
            num_scalar_prefetch=0,
            grid=(B,),
            in_specs=in_specs,
            out_specs=act_spec,
        ),
        compiler_params=pltpu.CompilerParams(
            dimension_semantics=("parallel",)),
    )(*inputs)


def _reference(x, params, *, num_heads):
    """Pure-JAX reference mirroring the PyTorch EncoderLayer forward (eval mode)."""
    B, S, E = x.shape
    d = E // num_heads

    def layer_norm(y, g, b):
        mu = y.mean(-1, keepdims=True)
        var = ((y - mu) ** 2).mean(-1, keepdims=True)
        return (y - mu) / jnp.sqrt(var + _LN_EPS) * g + b

    x2 = layer_norm(x, params["ln1_g"], params["ln1_b"])
    q = x2 @ params["wq"] + params["bq"]
    k = x2 @ params["wk"] + params["bk"]
    v = x2 @ params["wv"] + params["bv"]

    def split(t):  # [B, S, E] -> [B, H, S, d]
        return t.reshape(B, S, num_heads, d).transpose(0, 2, 1, 3)

    q, k, v = split(q), split(k), split(v)
    attn = jnp.einsum("bhqd,bhkd->bhqk", q / math.sqrt(d), k)
    attn = jax.nn.softmax(attn, axis=-1)
    ctx = jnp.einsum("bhqk,bhkd->bhqd", attn, v)
    ctx = ctx.transpose(0, 2, 1, 3).reshape(B, S, E)
    x = x + (ctx @ params["wo"] + params["bo"])

    x2 = layer_norm(x, params["ln2_g"], params["ln2_b"])
    ff = jnp.maximum(x2 @ params["w1"] + params["b1"], 0.0) @ params["w2"] + params["b2"]
    return x + ff


if __name__ == "__main__":
    # Small but lane-dense shapes (E, ff_dim multiples of 128).
    B, S, E, H, F = 2, 16, 128, 4, 256

    key0 = jax.random.PRNGKey(0)
    keys = jax.random.split(key0, 17)

    def init_linear(kw, kb, fan_in, fan_out):
        bound = 1.0 / math.sqrt(fan_in)
        w = jax.random.uniform(kw, (fan_in, fan_out), jnp.float32, -bound, bound)
        b = jax.random.uniform(kb, (fan_out,), jnp.float32, -bound, bound)
        return w, b

    wq, bq = init_linear(keys[0], keys[1], E, E)
    wk, bk = init_linear(keys[2], keys[3], E, E)
    wv, bv = init_linear(keys[4], keys[5], E, E)
    wo, bo = init_linear(keys[6], keys[7], E, E)
    w1, b1 = init_linear(keys[8], keys[9], E, F)
    w2, b2 = init_linear(keys[10], keys[11], F, E)

    ln1_g = 1.0 + 0.05 * jax.random.normal(keys[12], (E,), jnp.float32)
    ln1_b = 0.05 * jax.random.normal(keys[13], (E,), jnp.float32)
    ln2_g = 1.0 + 0.05 * jax.random.normal(keys[14], (E,), jnp.float32)
    ln2_b = 0.05 * jax.random.normal(keys[15], (E,), jnp.float32)

    params = dict(wq=wq, bq=bq, wk=wk, bk=bk, wv=wv, bv=bv, wo=wo, bo=bo,
                  w1=w1, b1=b1, w2=w2, b2=b2,
                  ln1_g=ln1_g, ln1_b=ln1_b, ln2_g=ln2_g, ln2_b=ln2_b)

    x = jax.random.normal(keys[16], (B, S, E), jnp.float32)

    ref = _reference(x, params, num_heads=H)

    # f32 MXU path (tolerance accounts for the approximate EUP reciprocal in softmax).
    out = encoder_layer(x, params, num_heads=H)
    out = jax.block_until_ready(out)
    assert out.shape == (B, S, E)
    err = float(jnp.max(jnp.abs(out - ref)))
    assert jnp.allclose(out, ref, atol=2e-3, rtol=2e-3), f"f32 mismatch, max abs err {err}"

    # bf16 MXU-operand path (f32 accumulation) — ~2x MXU throughput, half the weight DMA.
    out_bf16 = encoder_layer(x, params, num_heads=H, compute_dtype=jnp.bfloat16)
    out_bf16 = jax.block_until_ready(out_bf16)
    err_bf16 = float(jnp.max(jnp.abs(out_bf16 - ref)))
    assert jnp.allclose(out_bf16, ref, atol=5e-2, rtol=5e-2), \
        f"bf16 mismatch, max abs err {err_bf16}"

    print("KERNEL_OK")
</pallas_src>

<mosaic_0001>
module attributes {stable_mosaic.version = 11 : i64} {
  func.func @_encoder_layer_kernel(%arg0: i32, %arg1: memref<1x16x128xf32, #tpu.memory_space<vmem>>, %arg2: memref<1x128xf32, #tpu.memory_space<vmem>>, %arg3: memref<1x128xf32, #tpu.memory_space<vmem>>, %arg4: memref<4x128x32xf32, #tpu.memory_space<vmem>>, %arg5: memref<4x1x32xf32, #tpu.memory_space<vmem>>, %arg6: memref<4x128x32xf32, #tpu.memory_space<vmem>>, %arg7: memref<4x1x32xf32, #tpu.memory_space<vmem>>, %arg8: memref<4x128x32xf32, #tpu.memory_space<vmem>>, %arg9: memref<4x1x32xf32, #tpu.memory_space<vmem>>, %arg10: memref<4x32x128xf32, #tpu.memory_space<vmem>>, %arg11: memref<1x128xf32, #tpu.memory_space<vmem>>, %arg12: memref<1x128xf32, #tpu.memory_space<vmem>>, %arg13: memref<1x128xf32, #tpu.memory_space<vmem>>, %arg14: memref<128x256xf32, #tpu.memory_space<vmem>>, %arg15: memref<1x256xf32, #tpu.memory_space<vmem>>, %arg16: memref<256x128xf32, #tpu.memory_space<vmem>>, %arg17: memref<1x128xf32, #tpu.memory_space<vmem>>, %arg18: memref<1x16x128xf32, #tpu.memory_space<vmem>>) attributes {dimension_semantics = [#tpu.dimension_semantics<parallel>], iteration_bounds = array<i64: 2>, scalar_prefetch = 0 : i64, scratch_operands = 0 : i64, tpu.core_type = #tpu.core_type<tc>, window_params = [{transform_indices = @transform_0, window_bounds = array<i64: 1, 16, 128>}, {pipeline_mode = #tpu.pipeline_mode<synchronous>, transform_indices = @transform_1, window_bounds = array<i64: 1, 128>}, {pipeline_mode = #tpu.pipeline_mode<synchronous>, transform_indices = @transform_2, window_bounds = array<i64: 1, 128>}, {pipeline_mode = #tpu.pipeline_mode<synchronous>, transform_indices = @transform_3, window_bounds = array<i64: 4, 128, 32>}, {pipeline_mode = #tpu.pipeline_mode<synchronous>, transform_indices = @transform_4, window_bounds = array<i64: 4, 1, 32>}, {pipeline_mode = #tpu.pipeline_mode<synchronous>, transform_indices = @transform_5, window_bounds = array<i64: 4, 128, 32>}, {pipeline_mode = #tpu.pipeline_mode<synchronous>, transform_indices = @transform_6, window_bounds = array<i64: 4, 1, 32>}, {pipeline_mode = #tpu.pipeline_mode<synchronous>, transform_indices = @transform_7, window_bounds = array<i64: 4, 128, 32>}, {pipeline_mode = #tpu.pipeline_mode<synchronous>, transform_indices = @transform_8, window_bounds = array<i64: 4, 1, 32>}, {pipeline_mode = #tpu.pipeline_mode<synchronous>, transform_indices = @transform_9, window_bounds = array<i64: 4, 32, 128>}, {pipeline_mode = #tpu.pipeline_mode<synchronous>, transform_indices = @transform_10, window_bounds = array<i64: 1, 128>}, {pipeline_mode = #tpu.pipeline_mode<synchronous>, transform_indices = @transform_11, window_bounds = array<i64: 1, 128>}, {pipeline_mode = #tpu.pipeline_mode<synchronous>, transform_indices = @transform_12, window_bounds = array<i64: 1, 128>}, {pipeline_mode = #tpu.pipeline_mode<synchronous>, transform_indices = @transform_13, window_bounds = array<i64: 128, 256>}, {pipeline_mode = #tpu.pipeline_mode<synchronous>, transform_indices = @transform_14, window_bounds = array<i64: 1, 256>}, {pipeline_mode = #tpu.pipeline_mode<synchronous>, transform_indices = @transform_15, window_bounds = array<i64: 256, 128>}, {pipeline_mode = #tpu.pipeline_mode<synchronous>, transform_indices = @transform_16, window_bounds = array<i64: 1, 128>}, {transform_indices = @transform_17, window_bounds = array<i64: 1, 16, 128>}]} {
    %c0 = arith.constant 0 : index
    %c0_0 = arith.constant 0 : index
    %c0_1 = arith.constant 0 : index
    %0 = vector.load %arg1[%c0, %c0_0, %c0_1] : memref<1x16x128xf32, #tpu.memory_space<vmem>>, vector<1x16x128xf32>
    %1 = vector.shape_cast %0 : vector<1x16x128xf32> to vector<16x128xf32>
    %cst = arith.constant dense<0.000000e+00> : vector<16xf32>
    %2 = vector.multi_reduction <add>, %1, %cst [1] : vector<16x128xf32> to vector<16xf32>
    %3 = vector.shape_cast %2 : vector<16xf32> to vector<16x1xf32>
    %cst_2 = arith.constant 1.280000e+02 : f32
    %4 = vector.broadcast %cst_2 : f32 to vector<16x1xf32>
    %5 = arith.divf %3, %4 : vector<16x1xf32>
    %6 = vector.broadcast %5 : vector<16x1xf32> to vector<16x128xf32>
    %7 = arith.subf %1, %6 : vector<16x128xf32>
    %8 = arith.mulf %7, %7 : vector<16x128xf32>
    %cst_3 = arith.constant dense<0.000000e+00> : vector<16xf32>
    %9 = vector.multi_reduction <add>, %8, %cst_3 [1] : vector<16x128xf32> to vector<16xf32>
    %10 = vector.shape_cast %9 : vector<16xf32> to vector<16x1xf32>
    %cst_4 = arith.constant 1.280000e+02 : f32
    %11 = vector.broadcast %cst_4 : f32 to vector<16x1xf32>
    %12 = arith.divf %10, %11 : vector<16x1xf32>
    %cst_5 = arith.constant 9.99999974E-6 : f32
    %13 = vector.broadcast %cst_5 : f32 to vector<16x1xf32>
    %14 = arith.addf %12, %13 : vector<16x1xf32>
    %15 = math.rsqrt %14 : vector<16x1xf32>
    %16 = vector.broadcast %15 : vector<16x1xf32> to vector<16x128xf32>
    %17 = arith.mulf %7, %16 : vector<16x128xf32>
    %c0_6 = arith.constant 0 : index
    %c0_7 = arith.constant 0 : index
    %18 = vector.load %arg2[%c0_6, %c0_7] : memref<1x128xf32, #tpu.memory_space<vmem>>, vector<1x128xf32>
    %19 = vector.broadcast %18 : vector<1x128xf32> to vector<16x128xf32>
    %20 = arith.mulf %17, %19 : vector<16x128xf32>
    %c0_8 = arith.constant 0 : index
    %c0_9 = arith.constant 0 : index
    %21 = vector.load %arg3[%c0_8, %c0_9] : memref<1x128xf32, #tpu.memory_space<vmem>>, vector<1x128xf32>
    %22 = vector.broadcast %21 : vector<1x128xf32> to vector<16x128xf32>
    %23 = arith.addf %20, %22 : vector<16x128xf32>
    %cst_10 = arith.constant 0.000000e+00 : f32
    %24 = vector.broadcast %cst_10 : f32 to vector<16x128xf32>
    %c0_11 = arith.constant 0 : index
    %c0_12 = arith.constant 0 : index
    %c0_13 = arith.constant 0 : index
    %25 = vector.load %arg4[%c0_11, %c0_12, %c0_13] : memref<4x128x32xf32, #tpu.memory_space<vmem>>, vector<1x128x32xf32>
    %26 = vector.shape_cast %25 : vector<1x128x32xf32> to vector<128x32xf32>
    %cst_14 = arith.constant dense<0.000000e+00> : vector<16x32xf32>
    %27 = tpu.matmul %23, %26, %cst_14 {dimension_numbers = #tpu.dot_dimension_numbers<[1], [0], [0], [1], [0, 0, 1, 1], [], []>} : vector<16x128xf32>, vector<128x32xf32>, vector<16x32xf32> -> vector<16x32xf32>
    %c0_15 = arith.constant 0 : index
    %c0_16 = arith.constant 0 : index
    %c0_17 = arith.constant 0 : index
    %28 = vector.load %arg5[%c0_15, %c0_16, %c0_17] : memref<4x1x32xf32, #tpu.memory_space<vmem>>, vector<1x1x32xf32>
    %29 = vector.shape_cast %28 : vector<1x1x32xf32> to vector<1x32xf32>
    %30 = vector.broadcast %29 : vector<1x32xf32> to vector<16x32xf32>
    %31 = arith.addf %27, %30 : vector<16x32xf32>
    %c0_18 = arith.constant 0 : index
    %c0_19 = arith.constant 0 : index
    %c0_20 = arith.constant 0 : index
    %32 = vector.load %arg6[%c0_18, %c0_19, %c0_20] : memref<4x128x32xf32, #tpu.memory_space<vmem>>, vector<1x128x32xf32>
    %33 = vector.shape_cast %32 : vector<1x128x32xf32> to vector<128x32xf32>
    %cst_21 = arith.constant dense<0.000000e+00> : vector<16x32xf32>
    %34 = tpu.matmul %23, %33, %cst_21 {dimension_numbers = #tpu.dot_dimension_numbers<[1], [0], [0], [1], [0, 0, 1, 1], [], []>} : vector<16x128xf32>, vector<128x32xf32>, vector<16x32xf32> -> vector<16x32xf32>
    %c0_22 = arith.constant 0 : index
    %c0_23 = arith.constant 0 : index
    %c0_24 = arith.constant 0 : index
    %35 = vector.load %arg7[%c0_22, %c0_23, %c0_24] : memref<4x1x32xf32, #tpu.memory_space<vmem>>, vector<1x1x32xf32>
    %36 = vector.shape_cast %35 : vector<1x1x32xf32> to vector<1x32xf32>
    %37 = vector.broadcast %36 : vector<1x32xf32> to vector<16x32xf32>
    %38 = arith.addf %34, %37 : vector<16x32xf32>
    %c0_25 = arith.constant 0 : index
    %c0_26 = arith.constant 0 : index
    %c0_27 = arith.constant 0 : index
    %39 = vector.load %arg8[%c0_25, %c0_26, %c0_27] : memref<4x128x32xf32, #tpu.memory_space<vmem>>, vector<1x128x32xf32>
    %40 = vector.shape_cast %39 : vector<1x128x32xf32> to vector<128x32xf32>
    %cst_28 = arith.constant dense<0.000000e+00> : vector<16x32xf32>
    %41 = tpu.matmul %23, %40, %cst_28 {dimension_numbers = #tpu.dot_dimension_numbers<[1], [0], [0], [1], [0, 0, 1, 1], [], []>} : vector<16x128xf32>, vector<128x32xf32>, vector<16x32xf32> -> vector<16x32xf32>
    %c0_29 = arith.constant 0 : index
    %c0_30 = arith.constant 0 : index
    %c0_31 = arith.constant 0 : index
    %42 = vector.load %arg9[%c0_29, %c0_30, %c0_31] : memref<4x1x32xf32, #tpu.memory_space<vmem>>, vector<1x1x32xf32>
    %43 = vector.shape_cast %42 : vector<1x1x32xf32> to vector<1x32xf32>
    %44 = vector.broadcast %43 : vector<1x32xf32> to vector<16x32xf32>
    %45 = arith.addf %41, %44 : vector<16x32xf32>
    %cst_32 = arith.constant dense<0.000000e+00> : vector<16x16xf32>
    %46 = tpu.matmul %31, %38, %cst_32 {dimension_numbers = #tpu.dot_dimension_numbers<[1], [1], [0], [0], [0, 0, 1, 0], [], []>} : vector<16x32xf32>, vector<16x32xf32>, vector<16x16xf32> -> vector<16x16xf32>
    %cst_33 = arith.constant dense<0xFF800000> : vector<16xf32>
    %47 = vector.multi_reduction <maximumf>, %46, %cst_33 [1] : vector<16x16xf32> to vector<16xf32>
    %48 = vector.shape_cast %47 : vector<16xf32> to vector<16x1xf32>
    %49 = vector.broadcast %48 : vector<16x1xf32> to vector<16x16xf32>
    %50 = arith.subf %46, %49 : vector<16x16xf32>
    %51 = math.exp %50 : vector<16x16xf32>
    %cst_34 = arith.constant dense<0.000000e+00> : vector<16xf32>
    %52 = vector.multi_reduction <add>, %51, %cst_34 [1] : vector<16x16xf32> to vector<16xf32>
    %53 = vector.shape_cast %52 : vector<16xf32> to vector<16x1xf32>
    %54 = tpu.reciprocal %53 {approx = true} : vector<16x1xf32> -> vector<16x1xf32>
    %55 = vector.broadcast %54 : vector<16x1xf32> to vector<16x16xf32>
    %56 = arith.mulf %51, %55 : vector<16x16xf32>
    %cst_35 = arith.constant dense<0.000000e+00> : vector<16x32xf32>
    %57 = tpu.matmul %56, %45, %cst_35 {dimension_numbers = #tpu.dot_dimension_numbers<[1], [0], [0], [1], [0, 0, 1, 1], [], []>} : vector<16x16xf32>, vector<16x32xf32>, vector<16x32xf32> -> vector<16x32xf32>
    %c0_36 = arith.constant 0 : index
    %c0_37 = arith.constant 0 : index
    %c0_38 = arith.constant 0 : index
    %58 = vector.load %arg10[%c0_36, %c0_37, %c0_38] : memref<4x32x128xf32, #tpu.memory_space<vmem>>, vector<1x32x128xf32>
    %59 = vector.shape_cast %58 : vector<1x32x128xf32> to vector<32x128xf32>
    %cst_39 = arith.constant dense<0.000000e+00> : vector<16x128xf32>
    %60 = tpu.matmul %57, %59, %cst_39 {dimension_numbers = #tpu.dot_dimension_numbers<[1], [0], [0], [1], [0, 0, 1, 1], [], []>} : vector<16x32xf32>, vector<32x128xf32>, vector<16x128xf32> -> vector<16x128xf32>
    %61 = arith.addf %24, %60 : vector<16x128xf32>
    %c1 = arith.constant 1 : index
    %c0_40 = arith.constant 0 : index
    %c0_41 = arith.constant 0 : index
    %62 = vector.load %arg4[%c1, %c0_40, %c0_41] : memref<4x128x32xf32, #tpu.memory_space<vmem>>, vector<1x128x32xf32>
    %63 = vector.shape_cast %62 : vector<1x128x32xf32> to vector<128x32xf32>
    %cst_42 = arith.constant dense<0.000000e+00> : vector<16x32xf32>
    %64 = tpu.matmul %23, %63, %cst_42 {dimension_numbers = #tpu.dot_dimension_numbers<[1], [0], [0], [1], [0, 0, 1, 1], [], []>} : vector<16x128xf32>, vector<128x32xf32>, vector<16x32xf32> -> vector<16x32xf32>
    %c1_43 = arith.constant 1 : index
    %c0_44 = arith.constant 0 : index
    %c0_45 = arith.constant 0 : index
    %65 = vector.load %arg5[%c1_43, %c0_44, %c0_45] : memref<4x1x32xf32, #tpu.memory_space<vmem>>, vector<1x1x32xf32>
    %66 = vector.shape_cast %65 : vector<1x1x32xf32> to vector<1x32xf32>
    %67 = vector.broadcast %66 : vector<1x32xf32> to vector<16x32xf32>
    %68 = arith.addf %64, %67 : vector<16x32xf32>
    %c1_46 = arith.constant 1 : index
    %c0_47 = arith.constant 0 : index
    %c0_48 = arith.constant 0 : index
    %69 = vector.load %arg6[%c1_46, %c0_47, %c0_48] : memref<4x128x32xf32, #tpu.memory_space<vmem>>, vector<1x128x32xf32>
    %70 = vector.shape_cast %69 : vector<1x128x32xf32> to vector<128x32xf32>
    %cst_49 = arith.constant dense<0.000000e+00> : vector<16x32xf32>
    %71 = tpu.matmul %23, %70, %cst_49 {dimension_numbers = #tpu.dot_dimension_numbers<[1], [0], [0], [1], [0, 0, 1, 1], [], []>} : vector<16x128xf32>, vector<128x32xf32>, vector<16x32xf32> -> vector<16x32xf32>
    %c1_50 = arith.constant 1 : index
    %c0_51 = arith.constant 0 : index
    %c0_52 = arith.constant 0 : index
    %72 = vector.load %arg7[%c1_50, %c0_51, %c0_52] : memref<4x1x32xf32, #tpu.memory_space<vmem>>, vector<1x1x32xf32>
    %73 = vector.shape_cast %72 : vector<1x1x32xf32> to vector<1x32xf32>
    %74 = vector.broadcast %73 : vector<1x32xf32> to vector<16x32xf32>
    %75 = arith.addf %71, %74 : vector<16x32xf32>
    %c1_53 = arith.constant 1 : index
    %c0_54 = arith.constant 0 : index
    %c0_55 = arith.constant 0 : index
    %76 = vector.load %arg8[%c1_53, %c0_54, %c0_55] : memref<4x128x32xf32, #tpu.memory_space<vmem>>, vector<1x128x32xf32>
    %77 = vector.shape_cast %76 : vector<1x128x32xf32> to vector<128x32xf32>
    %cst_56 = arith.constant dense<0.000000e+00> : vector<16x32xf32>
    %78 = tpu.matmul %23, %77, %cst_56 {dimension_numbers = #tpu.dot_dimension_numbers<[1], [0], [0], [1], [0, 0, 1, 1], [], []>} : vector<16x128xf32>, vector<128x32xf32>, vector<16x32xf32> -> vector<16x32xf32>
    %c1_57 = arith.constant 1 : index
    %c0_58 = arith.constant 0 : index
    %c0_59 = arith.constant 0 : index
    %79 = vector.load %arg9[%c1_57, %c0_58, %c0_59] : memref<4x1x32xf32, #tpu.memory_space<vmem>>, vector<1x1x32xf32>
    %80 = vector.shape_cast %79 : vector<1x1x32xf32> to vector<1x32xf32>
    %81 = vector.broadcast %80 : vector<1x32xf32> to vector<16x32xf32>
    %82 = arith.addf %78, %81 : vector<16x32xf32>
    %cst_60 = arith.constant dense<0.000000e+00> : vector<16x16xf32>
    %83 = tpu.matmul %68, %75, %cst_60 {dimension_numbers = #tpu.dot_dimension_numbers<[1], [1], [0], [0], [0, 0, 1, 0], [], []>} : vector<16x32xf32>, vector<16x32xf32>, vector<16x16xf32> -> vector<16x16xf32>
    %cst_61 = arith.constant dense<0xFF800000> : vector<16xf32>
    %84 = vector.multi_reduction <maximumf>, %83, %cst_61 [1] : vector<16x16xf32> to vector<16xf32>
    %85 = vector.shape_cast %84 : vector<16xf32> to vector<16x1xf32>
    %86 = vector.broadcast %85 : vector<16x1xf32> to vector<16x16xf32>
    %87 = arith.subf %83, %86 : vector<16x16xf32>
    %88 = math.exp %87 : vector<16x16xf32>
    %cst_62 = arith.constant dense<0.000000e+00> : vector<16xf32>
    %89 = vector.multi_reduction <add>, %88, %cst_62 [1] : vector<16x16xf32> to vector<16xf32>
    %90 = vector.shape_cast %89 : vector<16xf32> to vector<16x1xf32>
    %91 = tpu.reciprocal %90 {approx = true} : vector<16x1xf32> -> vector<16x1xf32>
    %92 = vector.broadcast %91 : vector<16x1xf32> to vector<16x16xf32>
    %93 = arith.mulf %88, %92 : vector<16x16xf32>
    %cst_63 = arith.constant dense<0.000000e+00> : vector<16x32xf32>
    %94 = tpu.matmul %93, %82, %cst_63 {dimension_numbers = #tpu.dot_dimension_numbers<[1], [0], [0], [1], [0, 0, 1, 1], [], []>} : vector<16x16xf32>, vector<16x32xf32>, vector<16x32xf32> -> vector<16x32xf32>
    %c1_64 = arith.constant 1 : index
    %c0_65 = arith.constant 0 : index
    %c0_66 = arith.constant 0 : index
    %95 = vector.load %arg10[%c1_64, %c0_65, %c0_66] : memref<4x32x128xf32, #tpu.memory_space<vmem>>, vector<1x32x128xf32>
    %96 = vector.shape_cast %95 : vector<1x32x128xf32> to vector<32x128xf32>
    %cst_67 = arith.constant dense<0.000000e+00> : vector<16x128xf32>
    %97 = tpu.matmul %94, %96, %cst_67 {dimension_numbers = #tpu.dot_dimension_numbers<[1], [0], [0], [1], [0, 0, 1, 1], [], []>} : vector<16x32xf32>, vector<32x128xf32>, vector<16x128xf32> -> vector<16x128xf32>
    %98 = arith.addf %61, %97 : vector<16x128xf32>
    %c2 = arith.constant 2 : index
    %c0_68 = arith.constant 0 : index
    %c0_69 = arith.constant 0 : index
    %99 = vector.load %arg4[%c2, %c0_68, %c0_69] : memref<4x128x32xf32, #tpu.memory_space<vmem>>, vector<1x128x32xf32>
    %100 = vector.shape_cast %99 : vector<1x128x32xf32> to vector<128x32xf32>
    %cst_70 = arith.constant dense<0.000000e+00> : vector<16x32xf32>
    %101 = tpu.matmul %23, %100, %cst_70 {dimension_numbers = #tpu.dot_dimension_numbers<[1], [0], [0], [1], [0, 0, 1, 1], [], []>} : vector<16x128xf32>, vector<128x32xf32>, vector<16x32xf32> -> vector<16x32xf32>
    %c2_71 = arith.constant 2 : index
    %c0_72 = arith.constant 0 : index
    %c0_73 = arith.constant 0 : index
    %102 = vector.load %arg5[%c2_71, %c0_72, %c0_73] : memref<4x1x32xf32, #tpu.memory_space<vmem>>, vector<1x1x32xf32>
    %103 = vector.shape_cast %102 : vector<1x1x32xf32> to vector<1x32xf32>
    %104 = vector.broadcast %103 : vector<1x32xf32> to vector<16x32xf32>
    %105 = arith.addf %101, %104 : vector<16x32xf32>
    %c2_74 = arith.constant 2 : index
    %c0_75 = arith.constant 0 : index
    %c0_76 = arith.constant 0 : index
    %106 = vector.load %arg6[%c2_74, %c0_75, %c0_76] : memref<4x128x32xf32, #tpu.memory_space<vmem>>, vector<1x128x32xf32>
    %107 = vector.shape_cast %106 : vector<1x128x32xf32> to vector<128x32xf32>
    %cst_77 = arith.constant dense<0.000000e+00> : vector<16x32xf32>
    %108 = tpu.matmul %23, %107, %cst_77 {dimension_numbers = #tpu.dot_dimension_numbers<[1], [0], [0], [1], [0, 0, 1, 1], [], []>} : vector<16x128xf32>, vector<128x32xf32>, vector<16x32xf32> -> vector<16x32xf32>
    %c2_78 = arith.constant 2 : index
    %c0_79 = arith.constant 0 : index
    %c0_80 = arith.constant 0 : index
    %109 = vector.load %arg7[%c2_78, %c0_79, %c0_80] : memref<4x1x32xf32, #tpu.memory_space<vmem>>, vector<1x1x32xf32>
    %110 = vector.shape_cast %109 : vector<1x1x32xf32> to vector<1x32xf32>
    %111 = vector.broadcast %110 : vector<1x32xf32> to vector<16x32xf32>
    %112 = arith.addf %108, %111 : vector<16x32xf32>
    %c2_81 = arith.constant 2 : index
    %c0_82 = arith.constant 0 : index
    %c0_83 = arith.constant 0 : index
    %113 = vector.load %arg8[%c2_81, %c0_82, %c0_83] : memref<4x128x32xf32, #tpu.memory_space<vmem>>, vector<1x128x32xf32>
    %114 = vector.shape_cast %113 : vector<1x128x32xf32> to vector<128x32xf32>
    %cst_84 = arith.constant dense<0.000000e+00> : vector<16x32xf32>
    %115 = tpu.matmul %23, %114, %cst_84 {dimension_numbers = #tpu.dot_dimension_numbers<[1], [0], [0], [1], [0, 0, 1, 1], [], []>} : vector<16x128xf32>, vector<128x32xf32>, vector<16x32xf32> -> vector<16x32xf32>
    %c2_85 = arith.constant 2 : index
    %c0_86 = arith.constant 0 : index
    %c0_87 = arith.constant 0 : index
    %116 = vector.load %arg9[%c2_85, %c0_86, %c0_87] : memref<4x1x32xf32, #tpu.memory_space<vmem>>, vector<1x1x32xf32>
    %117 = vector.shape_cast %116 : vector<1x1x32xf32> to vector<1x32xf32>
    %118 = vector.broadcast %117 : vector<1x32xf32> to vector<16x32xf32>
    %119 = arith.addf %115, %118 : vector<16x32xf32>
    %cst_88 = arith.constant dense<0.000000e+00> : vector<16x16xf32>
    %120 = tpu.matmul %105, %112, %cst_88 {dimension_numbers = #tpu.dot_dimension_numbers<[1], [1], [0], [0], [0, 0, 1, 0], [], []>} : vector<16x32xf32>, vector<16x32xf32>, vector<16x16xf32> -> vector<16x16xf32>
    %cst_89 = arith.constant dense<0xFF800000> : vector<16xf32>
    %121 = vector.multi_reduction <maximumf>, %120, %cst_89 [1] : vector<16x16xf32> to vector<16xf32>
    %122 = vector.shape_cast %121 : vector<16xf32> to vector<16x1xf32>
    %123 = vector.broadcast %122 : vector<16x1xf32> to vector<16x16xf32>
    %124 = arith.subf %120, %123 : vector<16x16xf32>
    %125 = math.exp %124 : vector<16x16xf32>
    %cst_90 = arith.constant dense<0.000000e+00> : vector<16xf32>
    %126 = vector.multi_reduction <add>, %125, %cst_90 [1] : vector<16x16xf32> to vector<16xf32>
    %127 = vector.shape_cast %126 : vector<16xf32> to vector<16x1xf32>
    %128 = tpu.reciprocal %127 {approx = true} : vector<16x1xf32> -> vector<16x1xf32>
    %129 = vector.broadcast %128 : vector<16x1xf32> to vector<16x16xf32>
    %130 = arith.mulf %125, %129 : vector<16x16xf32>
    %cst_91 = arith.constant dense<0.000000e+00> : vector<16x32xf32>
    %131 = tpu.matmul %130, %119, %cst_91 {dimension_numbers = #tpu.dot_dimension_numbers<[1], [0], [0], [1], [0, 0, 1, 1], [], []>} : vector<16x16xf32>, vector<16x32xf32>, vector<16x32xf32> -> vector<16x32xf32>
    %c2_92 = arith.constant 2 : index
    %c0_93 = arith.constant 0 : index
    %c0_94 = arith.constant 0 : index
    %132 = vector.load %arg10[%c2_92, %c0_93, %c0_94] : memref<4x32x128xf32, #tpu.memory_space<vmem>>, vector<1x32x128xf32>
    %133 = vector.shape_cast %132 : vector<1x32x128xf32> to vector<32x128xf32>
    %cst_95 = arith.constant dense<0.000000e+00> : vector<16x128xf32>
    %134 = tpu.matmul %131, %133, %cst_95 {dimension_numbers = #tpu.dot_dimension_numbers<[1], [0], [0], [1], [0, 0, 1, 1], [], []>} : vector<16x32xf32>, vector<32x128xf32>, vector<16x128xf32> -> vector<16x128xf32>
    %135 = arith.addf %98, %134 : vector<16x128xf32>
    %c3 = arith.constant 3 : index
    %c0_96 = arith.constant 0 : index
    %c0_97 = arith.constant 0 : index
    %136 = vector.load %arg4[%c3, %c0_96, %c0_97] : memref<4x128x32xf32, #tpu.memory_space<vmem>>, vector<1x128x32xf32>
    %137 = vector.shape_cast %136 : vector<1x128x32xf32> to vector<128x32xf32>
    %cst_98 = arith.constant dense<0.000000e+00> : vector<16x32xf32>
    %138 = tpu.matmul %23, %137, %cst_98 {dimension_numbers = #tpu.dot_dimension_numbers<[1], [0], [0], [1], [0, 0, 1, 1], [], []>} : vector<16x128xf32>, vector<128x32xf32>, vector<16x32xf32> -> vector<16x32xf32>
    %c3_99 = arith.constant 3 : index
    %c0_100 = arith.constant 0 : index
    %c0_101 = arith.constant 0 : index
    %139 = vector.load %arg5[%c3_99, %c0_100, %c0_101] : memref<4x1x32xf32, #tpu.memory_space<vmem>>, vector<1x1x32xf32>
    %140 = vector.shape_cast %139 : vector<1x1x32xf32> to vector<1x32xf32>
    %141 = vector.broadcast %140 : vector<1x32xf32> to vector<16x32xf32>
    %142 = arith.addf %138, %141 : vector<16x32xf32>
    %c3_102 = arith.constant 3 : index
    %c0_103 = arith.constant 0 : index
    %c0_104 = arith.constant 0 : index
    %143 = vector.load %arg6[%c3_102, %c0_103, %c0_104] : memref<4x128x32xf32, #tpu.memory_space<vmem>>, vector<1x128x32xf32>
    %144 = vector.shape_cast %143 : vector<1x128x32xf32> to vector<128x32xf32>
    %cst_105 = arith.constant dense<0.000000e+00> : vector<16x32xf32>
    %145 = tpu.matmul %23, %144, %cst_105 {dimension_numbers = #tpu.dot_dimension_numbers<[1], [0], [0], [1], [0, 0, 1, 1], [], []>} : vector<16x128xf32>, vector<128x32xf32>, vector<16x32xf32> -> vector<16x32xf32>
    %c3_106 = arith.constant 3 : index
    %c0_107 = arith.constant 0 : index
    %c0_108 = arith.constant 0 : index
    %146 = vector.load %arg7[%c3_106, %c0_107, %c0_108] : memref<4x1x32xf32, #tpu.memory_space<vmem>>, vector<1x1x32xf32>
    %147 = vector.shape_cast %146 : vector<1x1x32xf32> to vector<1x32xf32>
    %148 = vector.broadcast %147 : vector<1x32xf32> to vector<16x32xf32>
    %149 = arith.addf %145, %148 : vector<16x32xf32>
    %c3_109 = arith.constant 3 : index
    %c0_110 = arith.constant 0 : index
    %c0_111 = arith.constant 0 : index
    %150 = vector.load %arg8[%c3_109, %c0_110, %c0_111] : memref<4x128x32xf32, #tpu.memory_space<vmem>>, vector<1x128x32xf32>
    %151 = vector.shape_cast %150 : vector<1x128x32xf32> to vector<128x32xf32>
    %cst_112 = arith.constant dense<0.000000e+00> : vector<16x32xf32>
    %152 = tpu.matmul %23, %151, %cst_112 {dimension_numbers = #tpu.dot_dimension_numbers<[1], [0], [0], [1], [0, 0, 1, 1], [], []>} : vector<16x128xf32>, vector<128x32xf32>, vector<16x32xf32> -> vector<16x32xf32>
    %c3_113 = arith.constant 3 : index
    %c0_114 = arith.constant 0 : index
    %c0_115 = arith.constant 0 : index
    %153 = vector.load %arg9[%c3_113, %c0_114, %c0_115] : memref<4x1x32xf32, #tpu.memory_space<vmem>>, vector<1x1x32xf32>
    %154 = vector.shape_cast %153 : vector<1x1x32xf32> to vector<1x32xf32>
    %155 = vector.broadcast %154 : vector<1x32xf32> to vector<16x32xf32>
    %156 = arith.addf %152, %155 : vector<16x32xf32>
    %cst_116 = arith.constant dense<0.000000e+00> : vector<16x16xf32>
    %157 = tpu.matmul %142, %149, %cst_116 {dimension_numbers = #tpu.dot_dimension_numbers<[1], [1], [0], [0], [0, 0, 1, 0], [], []>} : vector<16x32xf32>, vector<16x32xf32>, vector<16x16xf32> -> vector<16x16xf32>
    %cst_117 = arith.constant dense<0xFF800000> : vector<16xf32>
    %158 = vector.multi_reduction <maximumf>, %157, %cst_117 [1] : vector<16x16xf32> to vector<16xf32>
    %159 = vector.shape_cast %158 : vector<16xf32> to vector<16x1xf32>
    %160 = vector.broadcast %159 : vector<16x1xf32> to vector<16x16xf32>
    %161 = arith.subf %157, %160 : vector<16x16xf32>
    %162 = math.exp %161 : vector<16x16xf32>
    %cst_118 = arith.constant dense<0.000000e+00> : vector<16xf32>
    %163 = vector.multi_reduction <add>, %162, %cst_118 [1] : vector<16x16xf32> to vector<16xf32>
    %164 = vector.shape_cast %163 : vector<16xf32> to vector<16x1xf32>
    %165 = tpu.reciprocal %164 {approx = true} : vector<16x1xf32> -> vector<16x1xf32>
    %166 = vector.broadcast %165 : vector<16x1xf32> to vector<16x16xf32>
    %167 = arith.mulf %162, %166 : vector<16x16xf32>
    %cst_119 = arith.constant dense<0.000000e+00> : vector<16x32xf32>
    %168 = tpu.matmul %167, %156, %cst_119 {dimension_numbers = #tpu.dot_dimension_numbers<[1], [0], [0], [1], [0, 0, 1, 1], [], []>} : vector<16x16xf32>, vector<16x32xf32>, vector<16x32xf32> -> vector<16x32xf32>
    %c3_120 = arith.constant 3 : index
    %c0_121 = arith.constant 0 : index
    %c0_122 = arith.constant 0 : index
    %169 = vector.load %arg10[%c3_120, %c0_121, %c0_122] : memref<4x32x128xf32, #tpu.memory_space<vmem>>, vector<1x32x128xf32>
    %170 = vector.shape_cast %169 : vector<1x32x128xf32> to vector<32x128xf32>
    %cst_123 = arith.constant dense<0.000000e+00> : vector<16x128xf32>
    %171 = tpu.matmul %168, %170, %cst_123 {dimension_numbers = #tpu.dot_dimension_numbers<[1], [0], [0], [1], [0, 0, 1, 1], [], []>} : vector<16x32xf32>, vector<32x128xf32>, vector<16x128xf32> -> vector<16x128xf32>
    %172 = arith.addf %135, %171 : vector<16x128xf32>
    %173 = arith.addf %1, %172 : vector<16x128xf32>
    %c0_124 = arith.constant 0 : index
    %c0_125 = arith.constant 0 : index
    %174 = vector.load %arg11[%c0_124, %c0_125] : memref<1x128xf32, #tpu.memory_space<vmem>>, vector<1x128xf32>
    %175 = vector.broadcast %174 : vector<1x128xf32> to vector<16x128xf32>
    %176 = arith.addf %173, %175 : vector<16x128xf32>
    %cst_126 = arith.constant dense<0.000000e+00> : vector<16xf32>
    %177 = vector.multi_reduction <add>, %176, %cst_126 [1] : vector<16x128xf32> to vector<16xf32>
    %178 = vector.shape_cast %177 : vector<16xf32> to vector<16x1xf32>
    %cst_127 = arith.constant 1.280000e+02 : f32
    %179 = vector.broadcast %cst_127 : f32 to vector<16x1xf32>
    %180 = arith.divf %178, %179 : vector<16x1xf32>
    %181 = vector.broadcast %180 : vector<16x1xf32> to vector<16x128xf32>
    %182 = arith.subf %176, %181 : vector<16x128xf32>
    %183 = arith.mulf %182, %182 : vector<16x128xf32>
    %cst_128 = arith.constant dense<0.000000e+00> : vector<16xf32>
    %184 = vector.multi_reduction <add>, %183, %cst_128 [1] : vector<16x128xf32> to vector<16xf32>
    %185 = vector.shape_cast %184 : vector<16xf32> to vector<16x1xf32>
    %cst_129 = arith.constant 1.280000e+02 : f32
    %186 = vector.broadcast %cst_129 : f32 to vector<16x1xf32>
    %187 = arith.divf %185, %186 : vector<16x1xf32>
    %cst_130 = arith.constant 9.99999974E-6 : f32
    %188 = vector.broadcast %cst_130 : f32 to vector<16x1xf32>
    %189 = arith.addf %187, %188 : vector<16x1xf32>
    %190 = math.rsqrt %189 : vector<16x1xf32>
    %191 = vector.broadcast %190 : vector<16x1xf32> to vector<16x128xf32>
    %192 = arith.mulf %182, %191 : vector<16x128xf32>
    %c0_131 = arith.constant 0 : index
    %c0_132 = arith.constant 0 : index
    %193 = vector.load %arg12[%c0_131, %c0_132] : memref<1x128xf32, #tpu.memory_space<vmem>>, vector<1x128xf32>
    %194 = vector.broadcast %193 : vector<1x128xf32> to vector<16x128xf32>
    %195 = arith.mulf %192, %194 : vector<16x128xf32>
    %c0_133 = arith.constant 0 : index
    %c0_134 = arith.constant 0 : index
    %196 = vector.load %arg13[%c0_133, %c0_134] : memref<1x128xf32, #tpu.memory_space<vmem>>, vector<1x128xf32>
    %197 = vector.broadcast %196 : vector<1x128xf32> to vector<16x128xf32>
    %198 = arith.addf %195, %197 : vector<16x128xf32>
    %c0_135 = arith.constant 0 : index
    %c0_136 = arith.constant 0 : index
    %199 = vector.load %arg14[%c0_135, %c0_136] : memref<128x256xf32, #tpu.memory_space<vmem>>, vector<128x256xf32>
    %cst_137 = arith.constant dense<0.000000e+00> : vector<16x256xf32>
    %200 = tpu.matmul %198, %199, %cst_137 {dimension_numbers = #tpu.dot_dimension_numbers<[1], [0], [0], [1], [0, 0, 1, 1], [], []>} : vector<16x128xf32>, vector<128x256xf32>, vector<16x256xf32> -> vector<16x256xf32>
    %c0_138 = arith.constant 0 : index
    %c0_139 = arith.constant 0 : index
    %201 = vector.load %arg15[%c0_138, %c0_139] : memref<1x256xf32, #tpu.memory_space<vmem>>, vector<1x256xf32>
    %202 = vector.broadcast %201 : vector<1x256xf32> to vector<16x256xf32>
    %203 = arith.addf %200, %202 : vector<16x256xf32>
    %cst_140 = arith.constant 0.000000e+00 : f32
    %204 = vector.broadcast %cst_140 : f32 to vector<16x256xf32>
    %205 = arith.maximumf %203, %204 : vector<16x256xf32>
    %c0_141 = arith.constant 0 : index
    %c0_142 = arith.constant 0 : index
    %206 = vector.load %arg16[%c0_141, %c0_142] : memref<256x128xf32, #tpu.memory_space<vmem>>, vector<256x128xf32>
    %cst_143 = arith.constant dense<0.000000e+00> : vector<16x128xf32>
    %207 = tpu.matmul %205, %206, %cst_143 {dimension_numbers = #tpu.dot_dimension_numbers<[1], [0], [0], [1], [0, 0, 1, 1], [], []>} : vector<16x256xf32>, vector<256x128xf32>, vector<16x128xf32> -> vector<16x128xf32>
    %c0_144 = arith.constant 0 : index
    %c0_145 = arith.constant 0 : index
    %208 = vector.load %arg17[%c0_144, %c0_145] : memref<1x128xf32, #tpu.memory_space<vmem>>, vector<1x128xf32>
    %209 = vector.broadcast %208 : vector<1x128xf32> to vector<16x128xf32>
    %210 = arith.addf %207, %209 : vector<16x128xf32>
    %211 = arith.addf %176, %210 : vector<16x128xf32>
    %c0_146 = arith.constant 0 : index
    %c0_147 = arith.constant 0 : index
    %c0_148 = arith.constant 0 : index
    %212 = vector.load %arg18[%c0_146, %c0_147, %c0_148] : memref<1x16x128xf32, #tpu.memory_space<vmem>>, vector<1x16x128xf32>
    %213 = vector.shape_cast %212 : vector<1x16x128xf32> to vector<16x128xf32>
    %214 = vector.shape_cast %211 : vector<16x128xf32> to vector<1x16x128xf32>
    tpu.vector_store %arg18[%c0_146, %c0_147, %c0_148], %214 {strides = array<i32>} : memref<1x16x128xf32, #tpu.memory_space<vmem>>, vector<1x16x128xf32>,
    return
  }
  func.func @transform_0(%arg0: i32) -> (i32, i32, i32) {
    %c0_i32 = arith.constant 0 : i32
    %c0_i32_0 = arith.constant 0 : i32
    %c0_i32_1 = arith.constant 0 : i32
    return %arg0, %c0_i32, %c0_i32_0 : i32, i32, i32
  }
  func.func @transform_1(%arg0: i32) -> (i32, i32) {
    %c0_i32 = arith.constant 0 : i32
    %c0_i32_0 = arith.constant 0 : i32
    %c0_i32_1 = arith.constant 0 : i32
    return %c0_i32, %c0_i32_0 : i32, i32
  }
  func.func @transform_2(%arg0: i32) -> (i32, i32) {
    %c0_i32 = arith.constant 0 : i32
    %c0_i32_0 = arith.constant 0 : i32
    %c0_i32_1 = arith.constant 0 : i32
    return %c0_i32, %c0_i32_0 : i32, i32
  }
  func.func @transform_3(%arg0: i32) -> (i32, i32, i32) {
    %c0_i32 = arith.constant 0 : i32
    %c0_i32_0 = arith.constant 0 : i32
    %c0_i32_1 = arith.constant 0 : i32
    %c0_i32_2 = arith.constant 0 : i32
    return %c0_i32, %c0_i32_0, %c0_i32_1 : i32, i32, i32
  }
  func.func @transform_4(%arg0: i32) -> (i32, i32, i32) {
    %c0_i32 = arith.constant 0 : i32
    %c0_i32_0 = arith.constant 0 : i32
    %c0_i32_1 = arith.constant 0 : i32
    %c0_i32_2 = arith.constant 0 : i32
    return %c0_i32, %c0_i32_0, %c0_i32_1 : i32, i32, i32
  }
  func.func @transform_5(%arg0: i32) -> (i32, i32, i32) {
    %c0_i32 = arith.constant 0 : i32
    %c0_i32_0 = arith.constant 0 : i32
    %c0_i32_1 = arith.constant 0 : i32
    %c0_i32_2 = arith.constant 0 : i32
    return %c0_i32, %c0_i32_0, %c0_i32_1 : i32, i32, i32
  }
  func.func @transform_6(%arg0: i32) -> (i32, i32, i32) {
    %c0_i32 = arith.constant 0 : i32
    %c0_i32_0 = arith.constant 0 : i32
    %c0_i32_1 = arith.constant 0 : i32
    %c0_i32_2 = arith.constant 0 : i32
    return %c0_i32, %c0_i32_0, %c0_i32_1 : i32, i32, i32
  }
  func.func @transform_7(%arg0: i32) -> (i32, i32, i32) {
    %c0_i32 = arith.constant 0 : i32
    %c0_i32_0 = arith.constant 0 : i32
    %c0_i32_1 = arith.constant 0 : i32
    %c0_i32_2 = arith.constant 0 : i32
    return %c0_i32, %c0_i32_0, %c0_i32_1 : i32, i32, i32
  }
  func.func @transform_8(%arg0: i32) -> (i32, i32, i32) {
    %c0_i32 = arith.constant 0 : i32
    %c0_i32_0 = arith.constant 0 : i32
    %c0_i32_1 = arith.constant 0 : i32
    %c0_i32_2 = arith.constant 0 : i32
    return %c0_i32, %c0_i32_0, %c0_i32_1 : i32, i32, i32
  }
  func.func @transform_9(%arg0: i32) -> (i32, i32, i32) {
    %c0_i32 = arith.constant 0 : i32
    %c0_i32_0 = arith.constant 0 : i32
    %c0_i32_1 = arith.constant 0 : i32
    %c0_i32_2 = arith.constant 0 : i32
    return %c0_i32, %c0_i32_0, %c0_i32_1 : i32, i32, i32
  }
  func.func @transform_10(%arg0: i32) -> (i32, i32) {
    %c0_i32 = arith.constant 0 : i32
    %c0_i32_0 = arith.constant 0 : i32
    %c0_i32_1 = arith.constant 0 : i32
    return %c0_i32, %c0_i32_0 : i32, i32
  }
  func.func @transform_11(%arg0: i32) -> (i32, i32) {
    %c0_i32 = arith.constant 0 : i32
    %c0_i32_0 = arith.constant 0 : i32
    %c0_i32_1 = arith.constant 0 : i32
    return %c0_i32, %c0_i32_0 : i32, i32
  }
  func.func @transform_12(%arg0: i32) -> (i32, i32) {
    %c0_i32 = arith.constant 0 : i32
    %c0_i32_0 = arith.constant 0 : i32
    %c0_i32_1 = arith.constant 0 : i32
    return %c0_i32, %c0_i32_0 : i32, i32
  }
  func.func @transform_13(%arg0: i32) -> (i32, i32) {
    %c0_i32 = arith.constant 0 : i32
    %c0_i32_0 = arith.constant 0 : i32
    %c0_i32_1 = arith.constant 0 : i32
    return %c0_i32, %c0_i32_0 : i32, i32
  }
  func.func @transform_14(%arg0: i32) -> (i32, i32) {
    %c0_i32 = arith.constant 0 : i32
    %c0_i32_0 = arith.constant 0 : i32
    %c0_i32_1 = arith.constant 0 : i32
    return %c0_i32, %c0_i32_0 : i32, i32
  }
  func.func @transform_15(%arg0: i32) -> (i32, i32) {
    %c0_i32 = arith.constant 0 : i32
    %c0_i32_0 = arith.constant 0 : i32
    %c0_i32_1 = arith.constant 0 : i32
    return %c0_i32, %c0_i32_0 : i32, i32
  }
  func.func @transform_16(%arg0: i32) -> (i32, i32) {
    %c0_i32 = arith.constant 0 : i32
    %c0_i32_0 = arith.constant 0 : i32
    %c0_i32_1 = arith.constant 0 : i32
    return %c0_i32, %c0_i32_0 : i32, i32
  }
  func.func @transform_17(%arg0: i32) -> (i32, i32, i32) {
    %c0_i32 = arith.constant 0 : i32
    %c0_i32_0 = arith.constant 0 : i32
    %c0_i32_1 = arith.constant 0 : i32
    return %arg0, %c0_i32, %c0_i32_0 : i32, i32, i32
  }
}

</mosaic_0001>

<bundles_post_ra>
// kernel: tpu_custom_call.1
= control target key start
LH: loop header
LB: loop body
LE: loop exit
PB: predicated region body
PF: predicated region fallthrough
CT: control target
= control target key end

     0   :  { %s6242_s0 = inlined_call_operand.vmem [shape: f32[2,16,128], index: 0, kind: input, shape index: {}]   ;;  %s6243_s1 = inlined_call_operand.vmem [shape: f32[1,128], index: 1, kind: input, shape index: {}]   ;;  %s6244_s2 = inlined_call_operand.vmem [shape: f32[1,128], index: 2, kind: input, shape index: {}]   ;;  %s6245_s3 = inlined_call_operand.vmem [shape: f32[4,128,32], index: 3, kind: input, shape index: {}]   ;;  %s6246_s4 = inlined_call_operand.vmem [shape: f32[4,1,32], index: 4, kind: input, shape index: {}]   ;;  %s6247_s5 = inlined_call_operand.vmem [shape: f32[4,128,32], index: 5, kind: input, shape index: {}]   ;;  %s6248_s6 = inlined_call_operand.vmem [shape: f32[4,1,32], index: 6, kind: input, shape index: {}]   ;;  %s6249_s7 = inlined_call_operand.vmem [shape: f32[4,128,32], index: 7, kind: input, shape index: {}]   ;;  %s6250_s8 = inlined_call_operand.vmem [shape: f32[4,1,32], index: 8, kind: input, shape index: {}]   ;;  %s6251_s9 = inlined_call_operand.vmem [shape: f32[4,32,128], index: 9, kind: input, shape index: {}]   ;;  %s6252_s10 = inlined_call_operand.vmem [shape: f32[1,128], index: 10, kind: input, shape index: {}]   ;;  %s6253_s11 = inlined_call_operand.vmem [shape: f32[1,128], index: 11, kind: input, shape index: {}]   ;;  %s6254_s12 = inlined_call_operand.vmem [shape: f32[1,128], index: 12, kind: input, shape index: {}]   ;;  %s6255_s13 = inlined_call_operand.vmem [shape: f32[128,256], index: 13, kind: input, shape index: {}]   ;;  %s6256_s14 = inlined_call_operand.vmem [shape: f32[1,256], index: 14, kind: input, shape index: {}]   ;;  %s6257_s15 = inlined_call_operand.vmem [shape: f32[256,128], index: 15, kind: input, shape index: {}]   ;;  %s6258_s16 = inlined_call_operand.vmem [shape: f32[1,128], index: 16, kind: input, shape index: {}]   ;;  %s6259_s17 = inlined_call_operand.hbm [shape: f32[2,16,128], index: 17, kind: output, shape index: {}]  }
   0x1   :  { %6266 = sst [smem:[#allocation11_spill]] %s6242_s0 }
   0x2   :  { %6267 = sst [smem:[#allocation12_spill]] %s6243_s1 }
   0x3   :  { %22 = vsyncpa [#allocation3], 0 }
   0x4   :  { %24 = vsyncpa [#allocation3 + $0x1], 0  ;;  %s5090_s24 = smov 0   ;;  %s5092_s25 = smov 0  }
   0x5   :  { %s5094_s26 = smov 0   ;;  %s5096_s27 = smov 0  }
   0x6 LB: > { %6268 = sst [smem:[#allocation5_spill]] %s4982_s24  ;;  %s5111_s28 = sadd.s32 4294967295, %s4994_s27   ;;  %s4994_s27 = sphi %s5096_s27, %s6283_s27   ;;  %s4990_s26 = sphi %s5094_s26, %s6285_s26   ;;  %s4986_s25 = sphi %s5092_s25, %s6287_s25   ;;  %s4982_s24 = sphi %s5090_s24, %s6286_s24  }
   0x7   : > { %6269 = sst [smem:[#allocation6_spill]] %s4990_s26  ;;  %s3263_s29 = sadd.s32 4294967294, %s4994_s27  }
   0x8   : > { %6270 = sst [smem:[#allocation7_spill]] %s4994_s27  ;;  %s5115_s0 = sadd.s32 1, %s4994_s27  }
   0x9   : > { %6271 = sst [smem:[#allocation8_spill]] %s5115_s0  ;;  %s399_s30 = sadd.s32 1, %s4990_s26 }
   0xa   : > { %s396_s18 = ssub.s32 %s4994_s27, %s5115_s0  ;;  %p409_p0 = scmp.ne.s32.totalorder %s4990_s26, %s4986_s25 }
   0xb   : > { %p397_p1 = scmp.eq.s32.totalorder %s396_s18, 0  ;;  %p410_p2 = scmp.eq.s32.totalorder %s5111_s28, 1 }
   0xc   : > { %p415_p3 = scmp.ne.s32.totalorder %s4986_s25, %s4982_s24  ;;  %p416_p4 = scmp.eq.s32.totalorder %s3263_s29, 1 }
   0xd   : > { %s5126_s19 = scalar_select %p397_p1, %s4990_s26, %s399_s30  }
   0xe   : > { %p5128_p5 = por %p410_p2, %p409_p0  ;;  %p5132_p6 = por %p416_p4, %p415_p3 }
   0xf   : > { %6272 = sst [smem:[#allocation9_spill]] %s5126_s19  ;;  %p3266_p7 = scmp.ge.s32.totalorder %s4994_s27, 1 }
  0x10   : > { %s6274_s20 = scalar_select %p5132_p6, 1, 0 }
  0x11   : > { %p490_p8 = scmp.lt.s32.totalorder %s4994_s27, 3 }
  0x12   : > { %6275 = sst [smem:[#allocation10_spill]] %s6274_s20 }
  0x13   : > { %p491_p9 = pnand %p3266_p7, %p490_p8 }
  0x14   : > { %p542_p10 = scmp.lt.s32.totalorder (!%p491_p9), %s5111_s28, 1  ;;  %s6276_s30 = sld [smem:[#allocation11_spill]] (!%p491_p9)  ;;  %v590_v2 = vld [vmem:[%s6245_s3] sm:$0xff] (!%p491_p9)  ;;  %v591_v3 = vld [vmem:[%s6245_s3 + $0x8] sm:$0xff] (!%p491_p9)  ;;  %v592_v7 = vld [vmem:[%s6245_s3 + $0x10] sm:$0xff] (!%p491_p9)  ;;  %vm884_vm0 = vcmask (!%p491_p9), 261120  }
  0x15   : > { %494 = sbr.rel (%p491_p9) target bundleno = 5090 (0x13e2), region = 88  ;;  %v688_v4 = vld [vmem:[%s6247_s5] sm:$0xff] (!%p491_p9)  ;;  %v4322_v5 = vpack.c.bf16 (!%p491_p9), %v591_v3, %v590_v2  ;;  %v689_v6 = vld [vmem:[%s6247_s5 + $0x8] sm:$0xff] (!%p491_p9)  ;;  %v593_v8 = vld [vmem:[%s6245_s3 + $0x18] sm:$0xff] (!%p491_p9)  ;;  %s6277_s20 = sld [smem:[#allocation12_spill]] (!%p491_p9)  ;;  %vm972_vm2 = vcmask (!%p491_p9), 130048  }
  0x16   : > { %v4354_v9 = vpack.c.bf16 (!%p491_p9), %v689_v6, %v688_v4  ;;  %v4326_v10 = vpack.c.bf16 (!%p491_p9), %v593_v8, %v592_v7  ;;  %v690_v11 = vld [vmem:[%s6247_s5 + $0x10] sm:$0xff] (!%p491_p9)  ;;  %v691_v12 = vld [vmem:[%s6247_s5 + $0x18] sm:$0xff] (!%p491_p9)  ;;  %v594_v22 = vld [vmem:[%s6245_s3 + $0x20] sm:$0xff] (!%p491_p9)  ;;  %s539_s29 = sand.u32 (!%p491_p9), 1, %s4986_s25   ;;  %s3491_s24 = sshll.u32 (!%p491_p9), %s5111_s28, 8 }
  0x17   : > { %4323 = vmatprep.subr.bf16.mxu0 (!%p491_p9), %v4322_v5  ;;  %v4358_v13 = vpack.c.bf16 (!%p491_p9), %v691_v12, %v690_v11  ;;  %v595_v23 = vld [vmem:[%s6245_s3 + $0x28] sm:$0xff] (!%p491_p9)  ;;  %v692_v25 = vld [vmem:[%s6247_s5 + $0x20] sm:$0xff] (!%p491_p9)  ;;  %v596_v28 = vld [vmem:[%s6245_s3 + $0x30] sm:$0xff] (!%p491_p9)  ;;  %s3267_s0 = sshll.u32 (!%p491_p9), %s539_s29, 4 }
  0x18   : > { %4325 = vmatpush3.bf16.msra.mxu0 (!%p491_p9), %v4322_v5  ;;  %4355 = vmatprep.subr.bf16.mxu1 (!%p491_p9), %v4354_v9  ;;  %v4330_v24 = vpack.c.bf16 (!%p491_p9), %v595_v23, %v594_v22  ;;  %v693_v26 = vld [vmem:[%s6247_s5 + $0x28] sm:$0xff] (!%p491_p9)  ;;  %v597_v29 = vld [vmem:[%s6245_s3 + $0x38] sm:$0xff] (!%p491_p9)  ;;  %v694_v31 = vld [vmem:[%s6247_s5 + $0x30] sm:$0xff] (!%p491_p9) }
  0x19   : > { %4357 = vmatpush3.bf16.msra.mxu1 (!%p491_p9), %v4354_v9  ;;  %4327 = vmatprep.subr.bf16.mxu0 (!%p491_p9), %v4326_v10  ;;  %v4362_v27 = vpack.c.bf16 (!%p491_p9), %v693_v26, %v692_v25  ;;  %v4334_v30 = vpack.c.bf16 (!%p491_p9), %v597_v29, %v596_v28  ;;  %v695_v32 = vld [vmem:[%s6247_s5 + $0x38] sm:$0xff] (!%p491_p9)  ;;  %v598_v34 = vld [vmem:[%s6245_s3 + $0x40] sm:$0xff] (!%p491_p9)  ;;  %v599_v35 = vld [vmem:[%s6245_s3 + $0x48] sm:$0xff] (!%p491_p9) }
  0x1a   : > { %4359 = vmatprep.subr.bf16.mxu1 (!%p491_p9), %v4358_v13  ;;  %v4366_v33 = vpack.c.bf16 (!%p491_p9), %v695_v32, %v694_v31  ;;  %v4338_v36 = vpack.c.bf16 (!%p491_p9), %v599_v35, %v598_v34  ;;  %v696_v37 = vld [vmem:[%s6247_s5 + $0x40] sm:$0xff] (!%p491_p9)  ;;  %v697_v38 = vld [vmem:[%s6247_s5 + $0x48] sm:$0xff] (!%p491_p9)  ;;  %v600_v40 = vld [vmem:[%s6245_s3 + $0x50] sm:$0xff] (!%p491_p9) }
  0x1b   : > { %v4370_v39 = vpack.c.bf16 (!%p491_p9), %v697_v38, %v696_v37  ;;  %v601_v41 = vld [vmem:[%s6245_s3 + $0x58] sm:$0xff] (!%p491_p9)  ;;  %v698_v43 = vld [vmem:[%s6247_s5 + $0x50] sm:$0xff] (!%p491_p9)  ;;  %v602_v46 = vld [vmem:[%s6245_s3 + $0x60] sm:$0xff] (!%p491_p9) }
  0x1c   : > { %s543_s21 = scalar_select %p542_p10, %s5111_s28, 1  ;;  %4329 = vmatpush3.bf16.msra.mxu0 %v4326_v10  ;;  %v4342_v42 = vpack.c.bf16 %v601_v41, %v600_v40  ;;  %v699_v44 = vld [vmem:[%s6247_s5 + $0x58] sm:$0xff]  ;;  %v603_v47 = vld [vmem:[%s6245_s3 + $0x68] sm:$0xff]  ;;  %v700_v49 = vld [vmem:[%s6247_s5 + $0x60] sm:$0xff] }
  0x1d   : > { %4361 = vmatpush3.bf16.msra.mxu1 %v4358_v13  ;;  %4331 = vmatprep.subr.bf16.mxu0 %v4330_v24  ;;  %v4374_v45 = vpack.c.bf16 %v699_v44, %v698_v43  ;;  %v4346_v48 = vpack.c.bf16 %v603_v47, %v602_v46  ;;  %v701_v50 = vld [vmem:[%s6247_s5 + $0x68] sm:$0xff]  ;;  %v604_v52 = vld [vmem:[%s6245_s3 + $0x70] sm:$0xff]  ;;  %v605_v53 = vld [vmem:[%s6245_s3 + $0x78] sm:$0xff]  ;;  %s4997_s28 = smov [#allocation2]  }
  0x1e   : > { %s3490_s22 = sshll.u32 %s543_s21, 4  ;;  %4363 = vmatprep.subr.bf16.mxu1 %v4362_v27  ;;  %v4378_v51 = vpack.c.bf16 %v701_v50, %v700_v49  ;;  %v4350_v54 = vpack.c.bf16 %v605_v53, %v604_v52  ;;  %v702_v55 = vld [vmem:[%s6247_s5 + $0x70] sm:$0xff]  ;;  %v703_v56 = vld [vmem:[%s6247_s5 + $0x78] sm:$0xff]  ;;  %v786_v58 = vld [vmem:[%s6249_s7] sm:$0xff]  ;;  %s6198_s21 = scalar_lea.hbm %s6259_s17, %s3491_s24 }
  0x1f   : > { %s5143_s18 = scalar_lea.vmem %s6276_s30, %s3490_s22  ;;  %v4382_v57 = vpack.c.bf16 %v703_v56, %v702_v55  ;;  %v787_v59 = vld [vmem:[%s6249_s7 + $0x8] sm:$0xff]  ;;  %v3270_v4 = vld [vmem:[%s6277_s20] ss:$0 sm:$0xff]  ;;  %v788_v11 = vld [vmem:[%s6249_s7 + $0x10] sm:$0xff]  ;;  %s6201_s22 = scalar_lea.sflag [#allocation3], %s539_s29 }
  0x20   : > { %v547_v0 = vld [vmem:[%s5143_s18] sm:$0xff]  ;;  %v548_v1 = vld [vmem:[%s5143_s18 + $0x8] sm:$0xff]  ;;  %4333 = vmatpush3.bf16.msra.mxu0 %v4330_v24  ;;  %v4386_v60 = vpack.c.bf16 %v787_v59, %v786_v58  ;;  %v789_v12 = vld [vmem:[%s6249_s7 + $0x18] sm:$0xff]  ;;  %s4936_s30 = sshll.u32 %s4997_s28, 4  ;;  %s4937_s30 = int_to_ptr.vmem [resolvable:$false] %s4936_s30 }
  0x21   : > { %549 = vadd.xlane.f32.xlu0 %v547_v0  ;;  %4365 = vmatpush3.bf16.msra.mxu1 %v4362_v27  ;;  %v3271_v6 = vld [vmem:[%s6244_s2] ss:$0 sm:$0xff]  ;;  %v795_v23 = vld [vmem:[%s6249_s7 + $0x48] sm:$0xff]  ;;  %v796_v25 = vld [vmem:[%s6249_s7 + $0x50] sm:$0xff]  ;;  %s4938_s26 = scalar_lea.vmem %s4937_s30, 512 }
  0x22   : > { %4335 = vmatprep.subr.bf16.mxu0 %v4334_v30  ;;  %4367 = vmatprep.subr.bf16.mxu1 %v4366_v33  ;;  %v794_v22 = vld [vmem:[%s6249_s7 + $0x40] sm:$0xff]  ;;  %v797_v26 = vld [vmem:[%s6249_s7 + $0x58] sm:$0xff]  ;;  %v799_v29 = vld [vmem:[%s6249_s7 + $0x68] sm:$0xff] }
  0x23   : > { %v4402_v24 = vpack.c.bf16 %v795_v23, %v794_v22  ;;  %v4406_v27 = vpack.c.bf16 %v797_v26, %v796_v25  ;;  %v798_v28 = vld [vmem:[%s6249_s7 + $0x60] sm:$0xff]  ;;  %v800_v31 = vld [vmem:[%s6249_s7 + $0x70] sm:$0xff]  ;;  %v801_v32 = vld [vmem:[%s6249_s7 + $0x78] sm:$0xff] }
  0x24   : > { %4337 = vmatpush3.bf16.msra.mxu0 %v4334_v30  ;;  %v4410_v30 = vpack.c.bf16 %v799_v29, %v798_v28  ;;  %v3273_v34 = vld [vmem:[%s6248_s6] ss:$0 sm:$0xff]  ;;  %vm5331_vm1 = vmpackc.low %vm884_vm0, %vm884_vm0  ;;  %v3284_v49 = vld [vmem:[%s6245_s3 + $0x98] sm:$0xff] }
  0x25   : > { %551 = vadd.xlane.f32.xlu0 %v548_v1  ;;  %4369 = vmatpush3.bf16.msra.mxu1 %v4366_v33  ;;  %v4414_v33 = vpack.c.bf16 %v801_v32, %v800_v31  ;;  %v3272_v35 = vld [vmem:[%s6246_s4] ss:$0 sm:$0xff]  ;;  %v3286_v53 = vld [vmem:[%s6245_s3 + $0xa8] sm:$0xff]  ;;  %v3287_v55 = vld [vmem:[%s6245_s3 + $0xb0] sm:$0xff] }
  0x26   : > { %4339 = vmatprep.subr.bf16.mxu0 %v4338_v36  ;;  %4371 = vmatprep.subr.bf16.mxu1 %v4370_v39  ;;  %v3281_v41 = vld [vmem:[%s6245_s3 + $0x80] sm:$0xff]  ;;  %v3288_v56 = vld [vmem:[%s6245_s3 + $0xb8] sm:$0xff]  ;;  %v3290_v59 = vld [vmem:[%s6245_s3 + $0xc8] sm:$0xff] }
  0x27   : > { %v3285_v52 = vld [vmem:[%s6245_s3 + $0xa0] sm:$0xff]  ;;  %v3323_v23 = vld [vmem:[%s6249_s7 + $0xb0] sm:$0xff] }
  0x28   : > { %4341 = vmatpush3.bf16.msra.mxu0 %v4338_v36  ;;  %v3289_v58 = vld [vmem:[%s6245_s3 + $0xc0] sm:$0xff]  ;;  %v3327_v29 = vld [vmem:[%s6249_s7 + $0xd0] sm:$0xff] }
  0x29   : > { %4373 = vmatpush3.bf16.msra.mxu1 %v4370_v39  ;;  %4343 = vmatprep.subr.bf16.mxu0 %v4342_v42  ;;  %v3325_v26 = vld [vmem:[%s6249_s7 + $0xc0] sm:$0xff] }
  0x2a   : > { %4375 = vmatprep.subr.bf16.mxu1 %v4374_v45  ;;  %v3329_v32 = vld [vmem:[%s6249_s7 + $0xe0] sm:$0xff] }
  0x2c   : > { %4345 = vmatpush3.bf16.msra.mxu0 %v4342_v42  ;;  %v3282_v42 = vld [vmem:[%s6245_s3 + $0x88] sm:$0xff] }
  0x2d   : > { %4377 = vmatpush3.bf16.msra.mxu1 %v4374_v45  ;;  %4347 = vmatprep.subr.bf16.mxu0 %v4346_v48  ;;  %v4428_v47 = vpack.c.bf16 %v3282_v42, %v3281_v41  ;;  %v3351_v41 = vld [vmem:[%s6245_s3 + $0x110] sm:$0xff]  ;;  %v3352_v42 = vld [vmem:[%s6245_s3 + $0x118] sm:$0xff] }
  0x2e   : > { %4379 = vmatprep.subr.bf16.mxu1 %v4378_v51 }
  0x30   : > { %4349 = vmatpush3.bf16.msra.mxu0 %v4346_v48  ;;  %v3283_v48 = vld [vmem:[%s6245_s3 + $0x90] sm:$0xff] }
  0x31   : > { %4381 = vmatpush3.bf16.msra.mxu1 %v4378_v51  ;;  %4351 = vmatprep.subr.bf16.mxu0 %v4350_v54  ;;  %v4432_v51 = vpack.c.bf16 %v3284_v49, %v3283_v48  ;;  %v3355_v48 = vld [vmem:[%s6245_s3 + $0x130] sm:$0xff]  ;;  %v3356_v49 = vld [vmem:[%s6245_s3 + $0x138] sm:$0xff] }
  0x32   : > { %4383 = vmatprep.subr.bf16.mxu1 %v4382_v57 }
  0x34   : > { %4353 = vmatpush3.bf16.msra.mxu0 %v4350_v54  ;;  %v4436_v54 = vpack.c.bf16 %v3286_v53, %v3285_v52  ;;  %v3358_v52 = vld [vmem:[%s6245_s3 + $0x148] sm:$0xff] }
  0x35   : > { %4385 = vmatpush3.bf16.msra.mxu1 %v4382_v57  ;;  %4387 = vmatprep.subr.bf16.mxu0 %v4386_v60  ;;  %v4440_v57 = vpack.c.bf16 %v3288_v56, %v3287_v55  ;;  %v3360_v55 = vld [vmem:[%s6245_s3 + $0x158] sm:$0xff] }
  0xae   : > { %v550_v14 = vpop.xlane.xlu0 %549 }
  0xaf   : > { %v554_v15 = vmul.f32 0.0078125, %v550_v14 }
  0xb1   : > { %v5171_v16 = vsub.f32 %v547_v0, %v554_v15  ;;  %v4390_v15 = vpack.c.bf16 %v789_v12, %v788_v11 }
  0xb2   : > { %v552_v17 = vpop.xlane.xlu0 %551 }
  0xb3   : > { %v555_v18 = vmul.f32 0.0078125, %v552_v17  ;;  %v558_v19 = vmul.f32 %v5171_v16, %v5171_v16  ;;  %v791_v17 = vld [vmem:[%s6249_s7 + $0x28] sm:$0xff] }
  0xb5   : > { %v5175_v20 = vsub.f32 %v548_v1, %v555_v18  ;;  %560 = vadd.xlane.f32.xlu1 %v558_v19  ;;  %v792_v19 = vld [vmem:[%s6249_s7 + $0x30] sm:$0xff] }
  0xb7   : > { %v559_v21 = vmul.f32 %v5175_v20, %v5175_v20 }
  0xb9   : > { %562 = vadd.xlane.f32.xlu1 %v559_v21 }
 0x142   : > { %v561_v61 = vpop.xlane.xlu1 %560 }
 0x143   : > { %v564_v62 = vmul.f32 0.0078125, %v561_v61  ;;  %v3291_v61 = vld [vmem:[%s6245_s3 + $0xd0] sm:$0xff] }
 0x145   : > { %v566_v63 = vadd.f32 1e-05, %v564_v62  ;;  %v3292_v62 = vld [vmem:[%s6245_s3 + $0xd8] sm:$0xff] }
 0x146   : > { %v563_v0 = vpop.xlane.xlu1 %562 }
 0x147   : > { %4890 = vrsqrt.f32 %v566_v63  ;;  %v565_v1 = vmul.f32 0.0078125, %v563_v0  ;;  %v4448_v63 = vpack.c.bf16 %v3292_v62, %v3291_v61  ;;  %v3293_v0 = vld [vmem:[%s6245_s3 + $0xe0] sm:$0xff]  ;;  %v3364_v61 = vld [vmem:[%s6245_s3 + $0x178] sm:$0xff] }
 0x149   : > { %v567_v2 = vadd.f32 1e-05, %v565_v1  ;;  %v3294_v1 = vld [vmem:[%s6245_s3 + $0xe8] sm:$0xff] }
 0x14b   : > { %4892 = vrsqrt.f32 %v567_v2  ;;  %v3274_v2 = vld [vmem:[%s6250_s8] ss:$0 sm:$0xff] }
 0x151   : > { %v4891_v3 = vpop.eup %4890 }
 0x152   : > { %v570_v5 = vmul.f32 %v4891_v3, %v5171_v16  ;;  %v790_v16 = vld [vmem:[%s6249_s7 + $0x20] sm:$0xff] }
 0x153   : > { %v4394_v18 = vpack.c.bf16 %v791_v17, %v790_v16  ;;  %v3319_v17 = vld [vmem:[%s6249_s7 + $0x90] sm:$0xff] }
 0x154   : > { %v579_v7 = vmul.f32 %v3270_v4, %v570_v5 }
 0x155   : > { %v4893_v8 = vpop.eup %4892 }
 0x156   : > { %v5264_v9 = vadd.f32 %v3271_v6, %v579_v7  ;;  %v571_v10 = vmul.f32 %v4893_v8, %v5175_v20  ;;  %v793_v20 = vld [vmem:[%s6249_s7 + $0x38] sm:$0xff]  ;;  %v3295_v7 = vld [vmem:[%s6245_s3 + $0xf0] sm:$0xff] }
 0x157   : > { %v4398_v21 = vpack.c.bf16 %v793_v20, %v792_v19  ;;  %v3296_v8 = vld [vmem:[%s6245_s3 + $0xf8] sm:$0xff]  ;;  %v3321_v20 = vld [vmem:[%s6249_s7 + $0xa0] sm:$0xff] }
 0x158   : > { %v580_v13 = vmul.f32 %v3270_v4, %v571_v10  ;;  %3834 = vmatprep.mubr.f32.mxu0 %v5264_v9  ;;  %3869 = vmatprep.mubr.f32.mxu1 %v5264_v9  ;;  %v4452_v4 = vpack.c.bf16 %v3294_v1, %v3293_v0  ;;  %v4456_v12 = vpack.c.bf16 %v3296_v8, %v3295_v7  ;;  %v3386_v0 = vld [vmem:[%s6249_s7 + $0x108] sm:$0xff]  ;;  %v3391_v8 = vld [vmem:[%s6249_s7 + $0x130] sm:$0xff] }
 0x15a   : > { %v5275_v14 = vadd.f32 %v3271_v6, %v580_v13  ;;  %v3317_v13 = vld [vmem:[%s6249_s7 + $0x80] sm:$0xff] }
 0x15c   : > { %3835 = vmatmul.mubr.f32.vlgmr.msra.gmra.mrb[0].mxu0 %v5275_v14  ;;  %3870 = vmatmul.mubr.f32.vlgmr.msra.gmra.mrb[0].mxu1 %v5275_v14 }
 0x15d   : > { %4389 = vmatpush3.bf16.msra.mxu0 %v4386_v60  ;;  %3904 = vmatprep.mubr.f32.mxu0 %v5264_v9  ;;  %v4444_v60 = vpack.c.bf16 %v3290_v59, %v3289_v58  ;;  %v3362_v58 = vld [vmem:[%s6245_s3 + $0x168] sm:$0xff] }
 0x15e   : > { %4391 = vmatprep.subr.bf16.mxu0 %v4390_v15 }
 0x161   : > { %4393 = vmatpush3.bf16.msra.mxu0 %v4390_v15  ;;  %v3318_v15 = vld [vmem:[%s6249_s7 + $0x88] sm:$0xff] }
 0x162   : > { %4395 = vmatprep.subr.bf16.mxu0 %v4394_v18  ;;  %v4492_v16 = vpack.c.bf16 %v3318_v15, %v3317_v13  ;;  %v3394_v13 = vld [vmem:[%s6249_s7 + $0x148] sm:$0xff] }
 0x165   : > { %4397 = vmatpush3.bf16.msra.mxu0 %v4394_v18  ;;  %v3320_v18 = vld [vmem:[%s6249_s7 + $0x98] sm:$0xff] }
 0x166   : > { %4399 = vmatprep.subr.bf16.mxu0 %v4398_v21  ;;  %v4496_v19 = vpack.c.bf16 %v3320_v18, %v3319_v17  ;;  %v3396_v17 = vld [vmem:[%s6249_s7 + $0x158] sm:$0xff] }
 0x169   : > { %4401 = vmatpush3.bf16.msra.mxu0 %v4398_v21  ;;  %v3322_v21 = vld [vmem:[%s6249_s7 + $0xa8] sm:$0xff] }
 0x16a   : > { %4403 = vmatprep.subr.bf16.mxu0 %v4402_v24  ;;  %v4500_v22 = vpack.c.bf16 %v3322_v21, %v3321_v20  ;;  %v3398_v20 = vld [vmem:[%s6249_s7 + $0x168] sm:$0xff] }
 0x16d   : > { %4405 = vmatpush3.bf16.msra.mxu0 %v4402_v24  ;;  %v3324_v24 = vld [vmem:[%s6249_s7 + $0xb8] sm:$0xff] }
 0x16e   : > { %4407 = vmatprep.subr.bf16.mxu0 %v4406_v27  ;;  %v4504_v25 = vpack.c.bf16 %v3324_v24, %v3323_v23  ;;  %v3400_v23 = vld [vmem:[%s6249_s7 + $0x178] sm:$0xff] }
 0x171   : > { %4409 = vmatpush3.bf16.msra.mxu0 %v4406_v27  ;;  %v3326_v27 = vld [vmem:[%s6249_s7 + $0xc8] sm:$0xff] }
 0x172   : > { %4411 = vmatprep.subr.bf16.mxu0 %v4410_v30  ;;  %v4508_v28 = vpack.c.bf16 %v3326_v27, %v3325_v26  ;;  %v3416_v26 = vld [vmem:[%s6245_s3 + $0x188] sm:$0xff] }
 0x175   : > { %4413 = vmatpush3.bf16.msra.mxu0 %v4410_v30  ;;  %v3328_v30 = vld [vmem:[%s6249_s7 + $0xd8] sm:$0xff] }
 0x176   : > { %4415 = vmatprep.subr.bf16.mxu0 %v4414_v33  ;;  %v4512_v31 = vpack.c.bf16 %v3328_v30, %v3327_v29  ;;  %v3418_v29 = vld [vmem:[%s6245_s3 + $0x198] sm:$0xff] }
 0x179   : > { %4417 = vmatpush3.bf16.msra.mxu0 %v4414_v33  ;;  %v3330_v33 = vld [vmem:[%s6249_s7 + $0xe8] sm:$0xff] }
 0x17c   : > { %3905 = vmatmul.mubr.f32.vlgmr.msra.gmra.mrb[2].mxu0 %v5275_v14 }
 0x22f   : > { %v3836_v36 = vpop.f32.mrb[0].mxu0  ;;  %v3871_v37 = vpop.f32.mrb[0].mxu1 }
 0x230   : > { %v783_v38 = vadd.f32 %v3871_v37, %v3273_v34  ;;  %v679_v39 = vpop.f32.mrb[1].mxu0  ;;  %v777_v40 = vpop.f32.mrb[1].mxu1  ;;  %v685_v50 = vadd.f32 %v3836_v36, %v3272_v35  ;;  %v3332_v36 = vld [vmem:[%s6249_s7 + $0xf8] sm:$0xff] }
 0x231   : > { %v680_v43 = vadd.f32 %v3272_v35, %v679_v39  ;;  %v778_v44 = vadd.f32 %v3273_v34, %v777_v40  ;;  %v4516_v34 = vpack.c.bf16 %v3330_v33, %v3329_v32  ;;  %v3331_v35 = vld [vmem:[%s6249_s7 + $0xf0] sm:$0xff]  ;;  %v3350_v39 = vld [vmem:[%s6245_s3 + $0x108] sm:$0xff] }
 0x232   : > { %v4520_v37 = vpack.c.bf16 %v3332_v36, %v3331_v35  ;;  %v3420_v32 = vld [vmem:[%s6245_s3 + $0x1a8] sm:$0xff]  ;;  %v3422_v35 = vld [vmem:[%s6245_s3 + $0x1b8] sm:$0xff] }
 0x233   : > { %v4418_v46 = vpack.c.bf16 %v783_v38, %v778_v44  ;;  %3911 = vmatprep.mubr.msk.f32.mxu1 %vm884_vm0, %v680_v43  ;;  %v3349_v38 = vld [vmem:[%s6245_s3 + $0x100] sm:$0xff]  ;;  %v4554_v43 = vpack.c.bf16 %v3352_v42, %v3351_v41  ;;  %v3426_v41 = vld [vmem:[%s6245_s3 + $0x1d8] sm:$0xff] }
 0x234   : > { %v4550_v40 = vpack.c.bf16 %v3350_v39, %v3349_v38  ;;  %v3353_v44 = vld [vmem:[%s6245_s3 + $0x120] sm:$0xff]  ;;  %v3424_v38 = vld [vmem:[%s6245_s3 + $0x1c8] sm:$0xff] }
 0x235   : > { %4420 = vmatprep.subr.msk.bf16.mxu1 %vm5331_vm1, %v4418_v46 }
 0x236   : > { %4423 = vmatpush3.bf16.xpose.msk.msra.mxu1 %vm5331_vm1, %v4418_v46  ;;  %v3354_v46 = vld [vmem:[%s6245_s3 + $0x128] sm:$0xff] }
 0x237   : > { %4429 = vmatprep.subr.bf16.mxu1 %v4428_v47 }
 0x23d   : > { %3912 = vmatmul.mubr.msk.f32.vlgmr.msra.gmra.mrb[2].mxu1 %vm884_vm0, %v685_v50  ;;  %v4562_v50 = vpack.c.bf16 %v3356_v49, %v3355_v48  ;;  %v3430_v48 = vld [vmem:[%s6245_s3 + $0x1f8] sm:$0xff] }
 0x23e   : > { %4431 = vmatpush3.bf16.msra.mxu1 %v4428_v47  ;;  %3953 = vmatprep.mubr.f32.mxu1 %v5264_v9  ;;  %v4558_v47 = vpack.c.bf16 %v3354_v46, %v3353_v44  ;;  %v3428_v44 = vld [vmem:[%s6245_s3 + $0x1e8] sm:$0xff] }
 0x23f   : > { %4433 = vmatprep.subr.bf16.mxu1 %v4432_v51 }
 0x242   : > { %4435 = vmatpush3.bf16.msra.mxu1 %v4432_v51  ;;  %v3357_v51 = vld [vmem:[%s6245_s3 + $0x140] sm:$0xff] }
 0x243   : > { %4437 = vmatprep.subr.bf16.mxu1 %v4436_v54  ;;  %v4566_v53 = vpack.c.bf16 %v3358_v52, %v3357_v51  ;;  %v3452_v51 = vld [vmem:[%s6249_s7 + $0x188] sm:$0xff] }
 0x246   : > { %4439 = vmatpush3.bf16.msra.mxu1 %v4436_v54  ;;  %v3359_v54 = vld [vmem:[%s6245_s3 + $0x150] sm:$0xff] }
 0x247   : > { %4441 = vmatprep.subr.bf16.mxu1 %v4440_v57  ;;  %v4570_v56 = vpack.c.bf16 %v3360_v55, %v3359_v54  ;;  %v3454_v54 = vld [vmem:[%s6249_s7 + $0x198] sm:$0xff] }
 0x24a   : > { %4443 = vmatpush3.bf16.msra.mxu1 %v4440_v57  ;;  %v3361_v57 = vld [vmem:[%s6245_s3 + $0x160] sm:$0xff] }
 0x24b   : > { %4445 = vmatprep.subr.bf16.mxu1 %v4444_v60  ;;  %v4574_v59 = vpack.c.bf16 %v3362_v58, %v3361_v57  ;;  %v3456_v57 = vld [vmem:[%s6249_s7 + $0x1a8] sm:$0xff] }
 0x24e   : > { %4447 = vmatpush3.bf16.msra.mxu1 %v4444_v60  ;;  %v3363_v60 = vld [vmem:[%s6245_s3 + $0x170] sm:$0xff] }
 0x24f   : > { %v3906_v3 = vpop.f32.mrb[2].mxu0  ;;  %4449 = vmatprep.subr.bf16.mxu1 %v4448_v63  ;;  %v4578_v62 = vpack.c.bf16 %v3364_v61, %v3363_v60  ;;  %v3458_v60 = vld [vmem:[%s6249_s7 + $0x1b8] sm:$0xff] }
 0x250   : > { %v881_v5 = vadd.f32 %v3906_v3, %v3274_v2  ;;  %v875_v6 = vpop.f32.mrb[3].mxu0  ;;  %v3388_v3 = vld [vmem:[%s6249_s7 + $0x118] sm:$0xff] }
 0x251   : > { %v876_v10 = vadd.f32 %v3274_v2, %v875_v6  ;;  %v3387_v2 = vld [vmem:[%s6249_s7 + $0x110] sm:$0xff]  ;;  %v3390_v6 = vld [vmem:[%s6249_s7 + $0x128] sm:$0xff] }
 0x252   : > { %4451 = vmatpush3.bf16.msra.mxu1 %v4448_v63  ;;  %v3385_v63 = vld [vmem:[%s6249_s7 + $0x100] sm:$0xff] }
 0x253   : > { %v4424_v11 = vpack.c.bf16 %v881_v5, %v876_v10  ;;  %4453 = vmatprep.subr.bf16.mxu1 %v4452_v4  ;;  %v4614_v1 = vpack.c.bf16 %v3386_v0, %v3385_v63  ;;  %v3389_v5 = vld [vmem:[%s6249_s7 + $0x120] sm:$0xff]  ;;  %v3392_v10 = vld [vmem:[%s6249_s7 + $0x138] sm:$0xff]  ;;  %v3460_v63 = vld [vmem:[%s6249_s7 + $0x1c8] sm:$0xff] }
 0x254   : > { %v4622_v7 = vpack.c.bf16 %v3390_v6, %v3389_v5  ;;  %v3464_v5 = vld [vmem:[%s6249_s7 + $0x1e8] sm:$0xff] }
 0x255   : > { %4425 = vmatprep.subr.bf16.mxu0 %v4424_v11 }
 0x256   : > { %4427 = vmatpush3.bf16.msra.mxu0 %v4424_v11  ;;  %4455 = vmatpush3.bf16.msra.mxu1 %v4452_v4  ;;  %v4618_v4 = vpack.c.bf16 %v3388_v3, %v3387_v2  ;;  %v4626_v11 = vpack.c.bf16 %v3392_v10, %v3391_v8  ;;  %v3462_v2 = vld [vmem:[%s6249_s7 + $0x1d8] sm:$0xff] }
 0x257   : > { %4457 = vmatprep.subr.bf16.mxu1 %v4456_v12  ;;  %v3466_v8 = vld [vmem:[%s6249_s7 + $0x1f8] sm:$0xff] }
 0x25a   : > { %4459 = vmatpush3.bf16.msra.mxu1 %v4456_v12  ;;  %v3393_v12 = vld [vmem:[%s6249_s7 + $0x140] sm:$0xff] }
 0x25b   : > { %4493 = vmatprep.subr.bf16.mxu1 %v4492_v16  ;;  %v4630_v15 = vpack.c.bf16 %v3394_v13, %v3393_v12 }
 0x25d   : > { %3954 = vmatmul.mubr.f32.vlgmr.msra.gmra.mrb[4].mxu1 %v5275_v14 }
 0x25e   : > { %4495 = vmatpush3.bf16.msra.mxu1 %v4492_v16  ;;  %4023 = vmatprep.mubr.f32.mxu1 %v5264_v9  ;;  %v3395_v16 = vld [vmem:[%s6249_s7 + $0x150] sm:$0xff] }
 0x25f   : > { %4497 = vmatprep.subr.bf16.mxu1 %v4496_v19  ;;  %v4634_v18 = vpack.c.bf16 %v3396_v17, %v3395_v16  ;;  %v5643_v16 = vld [vmem:[%s6246_s4 + $0x1] ss:$0 sm:$0xff] }
 0x262   : > { %4499 = vmatpush3.bf16.msra.mxu1 %v4496_v19  ;;  %v3397_v19 = vld [vmem:[%s6249_s7 + $0x160] sm:$0xff] }
 0x263   : > { %4501 = vmatprep.subr.bf16.mxu1 %v4500_v22  ;;  %v4638_v21 = vpack.c.bf16 %v3398_v20, %v3397_v19  ;;  %v3334_v20 = vld [vmem:[%s6250_s8 + $0x1] ss:$0 sm:$0xff] }
 0x266   : > { %4503 = vmatpush3.bf16.msra.mxu1 %v4500_v22  ;;  %v3399_v22 = vld [vmem:[%s6249_s7 + $0x170] sm:$0xff] }
 0x267   : > { %4505 = vmatprep.subr.bf16.mxu1 %v4504_v25  ;;  %v4642_v24 = vpack.c.bf16 %v3400_v23, %v3399_v22 }
 0x26a   : > { %4507 = vmatpush3.bf16.msra.mxu1 %v4504_v25  ;;  %v3415_v25 = vld [vmem:[%s6245_s3 + $0x180] sm:$0xff] }
 0x26b   : > { %4509 = vmatprep.subr.bf16.mxu1 %v4508_v28  ;;  %v4664_v27 = vpack.c.bf16 %v3416_v26, %v3415_v25  ;;  %v5658_v26 = vld [vmem:[%s6246_s4 + $0x2] ss:$0 sm:$0xff] }
 0x26e   : > { %4511 = vmatpush3.bf16.msra.mxu1 %v4508_v28  ;;  %v3417_v28 = vld [vmem:[%s6245_s3 + $0x190] sm:$0xff] }
 0x26f   : > { %4513 = vmatprep.subr.bf16.mxu1 %v4512_v31  ;;  %v4668_v30 = vpack.c.bf16 %v3418_v29, %v3417_v28 }
 0x272   : > { %4515 = vmatpush3.bf16.msra.mxu1 %v4512_v31  ;;  %v3419_v31 = vld [vmem:[%s6245_s3 + $0x1a0] sm:$0xff] }
 0x273   : > { %4517 = vmatprep.subr.bf16.mxu1 %v4516_v34  ;;  %v4672_v33 = vpack.c.bf16 %v3420_v32, %v3419_v31 }
 0x276   : > { %4519 = vmatpush3.bf16.msra.mxu1 %v4516_v34  ;;  %v3421_v34 = vld [vmem:[%s6245_s3 + $0x1b0] sm:$0xff] }
 0x277   : > { %4521 = vmatprep.subr.bf16.mxu1 %v4520_v37  ;;  %v4676_v36 = vpack.c.bf16 %v3422_v35, %v3421_v34 }
 0x27a   : > { %4523 = vmatpush3.bf16.msra.mxu1 %v4520_v37  ;;  %v3423_v37 = vld [vmem:[%s6245_s3 + $0x1c0] sm:$0xff] }
 0x27b   : > { %4551 = vmatprep.subr.bf16.mxu1 %v4550_v40  ;;  %v4680_v39 = vpack.c.bf16 %v3424_v38, %v3423_v37 }
 0x27d   : > { %4024 = vmatmul.mubr.f32.vlgmr.msra.gmra.mrb[6].mxu1 %v5275_v14 }
 0x27e   : > { %4553 = vmatpush3.bf16.msra.mxu1 %v4550_v40  ;;  %4094 = vmatprep.mubr.f32.mxu1 %v5264_v9  ;;  %v3425_v40 = vld [vmem:[%s6245_s3 + $0x1d0] sm:$0xff] }
 0x27f   : > { %4555 = vmatprep.subr.bf16.mxu1 %v4554_v43  ;;  %v4684_v42 = vpack.c.bf16 %v3426_v41, %v3425_v40 }
 0x282   : > { %4557 = vmatpush3.bf16.msra.mxu1 %v4554_v43  ;;  %v3427_v43 = vld [vmem:[%s6245_s3 + $0x1e0] sm:$0xff] }
 0x283   : > { %4559 = vmatprep.subr.bf16.mxu1 %v4558_v47  ;;  %v4688_v46 = vpack.c.bf16 %v3428_v44, %v3427_v43  ;;  %v5673_v43 = vld [vmem:[%s6246_s4 + $0x3] ss:$0 sm:$0xff] }
 0x286   : > { %4561 = vmatpush3.bf16.msra.mxu1 %v4558_v47  ;;  %v3429_v47 = vld [vmem:[%s6245_s3 + $0x1f0] sm:$0xff] }
 0x287   : > { %4563 = vmatprep.subr.bf16.mxu1 %v4562_v50  ;;  %v4692_v49 = vpack.c.bf16 %v3430_v48, %v3429_v47 }
 0x28a   : > { %4565 = vmatpush3.bf16.msra.mxu1 %v4562_v50  ;;  %v3451_v50 = vld [vmem:[%s6249_s7 + $0x180] sm:$0xff] }
 0x28b   : > { %4567 = vmatprep.subr.bf16.mxu1 %v4566_v53  ;;  %v4728_v52 = vpack.c.bf16 %v3452_v51, %v3451_v50  ;;  %v3299_v51 = vld [vmem:[%s6247_s5 + $0x80] sm:$0xff] }
 0x28e   : > { %4569 = vmatpush3.bf16.msra.mxu1 %v4566_v53  ;;  %v3453_v53 = vld [vmem:[%s6249_s7 + $0x190] sm:$0xff] }
 0x28f   : > { %4571 = vmatprep.subr.bf16.mxu1 %v4570_v56  ;;  %v4732_v55 = vpack.c.bf16 %v3454_v54, %v3453_v53  ;;  %v3468_v54 = vld [vmem:[%s6250_s8 + $0x3] ss:$0 sm:$0xff] }
 0x292   : > { %4573 = vmatpush3.bf16.msra.mxu1 %v4570_v56  ;;  %v3455_v56 = vld [vmem:[%s6249_s7 + $0x1a0] sm:$0xff] }
 0x293   : > { %4575 = vmatprep.subr.bf16.mxu1 %v4574_v59  ;;  %v4736_v58 = vpack.c.bf16 %v3456_v57, %v3455_v56 }
 0x296   : > { %4577 = vmatpush3.bf16.msra.mxu1 %v4574_v59  ;;  %v3457_v59 = vld [vmem:[%s6249_s7 + $0x1b0] sm:$0xff] }
 0x297   : > { %4579 = vmatprep.subr.bf16.mxu1 %v4578_v62  ;;  %v4740_v61 = vpack.c.bf16 %v3458_v60, %v3457_v59 }
 0x29a   : > { %4581 = vmatpush3.bf16.msra.mxu1 %v4578_v62  ;;  %v3459_v62 = vld [vmem:[%s6249_s7 + $0x1c0] sm:$0xff] }
 0x29b   : > { %4615 = vmatprep.subr.bf16.mxu1 %v4614_v1  ;;  %v4744_v0 = vpack.c.bf16 %v3460_v63, %v3459_v62  ;;  %v3301_v63 = vld [vmem:[%s6247_s5 + $0x90] sm:$0xff] }
 0x29d   : > { %4095 = vmatmul.mubr.f32.vlgmr.msra.gmra.mrb[8].mxu1 %v5275_v14 }
 0x29e   : > { %4617 = vmatpush3.bf16.msra.mxu1 %v4614_v1  ;;  %4164 = vmatprep.mubr.f32.mxu1 %v5264_v9  ;;  %v3461_v1 = vld [vmem:[%s6249_s7 + $0x1d0] sm:$0xff] }
 0x29f   : > { %4619 = vmatprep.subr.bf16.mxu1 %v4618_v4  ;;  %v4748_v3 = vpack.c.bf16 %v3462_v2, %v3461_v1 }
 0x2a2   : > { %4621 = vmatpush3.bf16.msra.mxu1 %v4618_v4  ;;  %v3463_v4 = vld [vmem:[%s6249_s7 + $0x1e0] sm:$0xff] }
 0x2a3   : > { %4623 = vmatprep.subr.bf16.mxu1 %v4622_v7  ;;  %v4752_v6 = vpack.c.bf16 %v3464_v5, %v3463_v4  ;;  %v3303_v5 = vld [vmem:[%s6247_s5 + $0xa0] sm:$0xff] }
 0x2a6   : > { %4625 = vmatpush3.bf16.msra.mxu1 %v4622_v7  ;;  %v3465_v7 = vld [vmem:[%s6249_s7 + $0x1f0] sm:$0xff] }
 0x2a7   : > { %4627 = vmatprep.subr.bf16.mxu1 %v4626_v11  ;;  %v4756_v10 = vpack.c.bf16 %v3466_v8, %v3465_v7  ;;  %v3305_v8 = vld [vmem:[%s6247_s5 + $0xb0] sm:$0xff] }
 0x2aa   : > { %4629 = vmatpush3.bf16.msra.mxu1 %v4626_v11 }
 0x2ab   : > { %4631 = vmatprep.subr.bf16.mxu1 %v4630_v15 }
 0x2ae   : > { %4633 = vmatpush3.bf16.msra.mxu1 %v4630_v15 }
 0x2af   : > { %4635 = vmatprep.subr.bf16.mxu1 %v4634_v18 }
 0x2b2   : > { %4637 = vmatpush3.bf16.msra.mxu1 %v4634_v18 }
 0x2b3   : > { %4639 = vmatprep.subr.bf16.mxu1 %v4638_v21 }
 0x2b6   : > { %4641 = vmatpush3.bf16.msra.mxu1 %v4638_v21 }
 0x2b7   : > { %4643 = vmatprep.subr.bf16.mxu1 %v4642_v24 }
 0x2ba   : > { %4645 = vmatpush3.bf16.msra.mxu1 %v4642_v24 }
 0x2bb   : > { %4665 = vmatprep.subr.bf16.mxu1 %v4664_v27 }
 0x2bd   : > { %4165 = vmatmul.mubr.f32.vlgmr.msra.gmra.mrb[10].mxu1 %v5275_v14 }
 0x2be   : > { %4667 = vmatpush3.bf16.msra.mxu1 %v4664_v27  ;;  %4224 = vmatprep.mubr.f32.mxu1 %v5264_v9 }
 0x2bf   : > { %4669 = vmatprep.subr.bf16.mxu1 %v4668_v30 }
 0x2c2   : > { %4671 = vmatpush3.bf16.msra.mxu1 %v4668_v30  ;;  %v3402_v30 = vld [vmem:[%s6250_s8 + $0x2] ss:$0 sm:$0xff] }
 0x2c3   : > { %4673 = vmatprep.subr.bf16.mxu1 %v4672_v33 }
 0x2c6   : > { %4675 = vmatpush3.bf16.msra.mxu1 %v4672_v33 }
 0x2c7   : > { %4677 = vmatprep.subr.bf16.mxu1 %v4676_v36 }
 0x2ca   : > { %4679 = vmatpush3.bf16.msra.mxu1 %v4676_v36 }
 0x2cb   : > { %4681 = vmatprep.subr.bf16.mxu1 %v4680_v39 }
 0x2ce   : > { %4683 = vmatpush3.bf16.msra.mxu1 %v4680_v39 }
 0x2cf   : > { %4685 = vmatprep.subr.bf16.mxu1 %v4684_v42 }
 0x2d2   : > { %4687 = vmatpush3.bf16.msra.mxu1 %v4684_v42 }
 0x2d3   : > { %4689 = vmatprep.subr.bf16.mxu1 %v4688_v46 }
 0x2d6   : > { %4691 = vmatpush3.bf16.msra.mxu1 %v4688_v46 }
 0x2d7   : > { %4693 = vmatprep.subr.bf16.mxu1 %v4692_v49 }
 0x2da   : > { %4695 = vmatpush3.bf16.msra.mxu1 %v4692_v49 }
 0x2db   : > { %4729 = vmatprep.subr.bf16.mxu1 %v4728_v52 }
 0x2dd   : > { %4225 = vmatmul.mubr.f32.vlgmr.msra.gmra.mrb[12].mxu1 %v5275_v14 }
 0x2de   : > { %4731 = vmatpush3.bf16.msra.mxu1 %v4728_v52  ;;  %4294 = vmatprep.mubr.f32.mxu1 %v5264_v9  ;;  %v3300_v52 = vld [vmem:[%s6247_s5 + $0x88] sm:$0xff] }
 0x2df   : > { %4733 = vmatprep.subr.bf16.mxu1 %v4732_v55  ;;  %v4460_v53 = vpack.c.bf16 %v3300_v52, %v3299_v51 }
 0x2e1   : > { %4461 = vmatprep.subr.bf16.mxu0 %v4460_v53 }
 0x2e2   : > { %4735 = vmatpush3.bf16.msra.mxu1 %v4732_v55 }
 0x2e3   : > { %4737 = vmatprep.subr.bf16.mxu1 %v4736_v58 }
 0x2e6   : > { %4739 = vmatpush3.bf16.msra.mxu1 %v4736_v58 }
 0x2e7   : > { %4741 = vmatprep.subr.bf16.mxu1 %v4740_v61 }
 0x2ea   : > { %4743 = vmatpush3.bf16.msra.mxu1 %v4740_v61 }
 0x2eb   : > { %4745 = vmatprep.subr.bf16.mxu1 %v4744_v0 }
 0x2ee   : > { %4747 = vmatpush3.bf16.msra.mxu1 %v4744_v0  ;;  %v3302_v0 = vld [vmem:[%s6247_s5 + $0x98] sm:$0xff] }
 0x2ef   : > { %4749 = vmatprep.subr.bf16.mxu1 %v4748_v3  ;;  %v4464_v4 = vpack.c.bf16 %v3302_v0, %v3301_v63  ;;  %v3343_v63 = vld [vmem:[%s6251_s9 + $0x30] sm:$0xff]  ;;  %v3344_v0 = vld [vmem:[%s6251_s9 + $0x38] sm:$0xff] }
 0x2f2   : > { %4751 = vmatpush3.bf16.msra.mxu1 %v4748_v3 }
 0x2f3   : > { %4753 = vmatprep.subr.bf16.mxu1 %v4752_v6 }
 0x2f6   : > { %4755 = vmatpush3.bf16.msra.mxu1 %v4752_v6  ;;  %v3304_v6 = vld [vmem:[%s6247_s5 + $0xa8] sm:$0xff] }
 0x2f7   : > { %4757 = vmatprep.subr.bf16.mxu1 %v4756_v10  ;;  %v4468_v7 = vpack.c.bf16 %v3304_v6, %v3303_v5  ;;  %v1076_v5 = vld [vmem:[%s6251_s9] sm:$0xff]  ;;  %v1077_v6 = vld [vmem:[%s6251_s9 + $0x8] sm:$0xff] }
 0x2fa   : > { %4759 = vmatpush3.bf16.msra.mxu1 %v4756_v10  ;;  %v3306_v10 = vld [vmem:[%s6247_s5 + $0xb8] sm:$0xff] }
 0x2fd   : > { %4295 = vmatmul.mubr.f32.vlgmr.msra.gmra.mrb[14].mxu1 %v5275_v14 }
 0x310   : > { %v3913_v11 = vpop.f32.mrb[2].mxu1 }
 0x311   : > { %v963_v12 = vpop.f32.mrb[3].mxu1  ;;  %v976_v13 = vsel %vm972_vm2, %v3913_v11, -inf }
 0x312   : > { %977 = vmax.xlane.f32.xlu1 %v976_v13  ;;  %v973_v15 = vsel %vm972_vm2, %v963_v12, -inf  ;;  %v3308_v13 = vld [vmem:[%s6247_s5 + $0xc8] sm:$0xff] }
 0x313   : > { %974 = vmax.xlane.f32.xlu0 %v973_v15 }
 0x330   : > { %v3955_v17 = vpop.f32.mrb[4].mxu1 }
 0x331   : > { %v5646_v18 = vadd.f32 %v3955_v17, %v5643_v16  ;;  %v5648_v19 = vpop.f32.mrb[5].mxu1  ;;  %v3309_v17 = vld [vmem:[%s6247_s5 + $0xd0] sm:$0xff] }
 0x350   : > { %v4025_v21 = vpop.f32.mrb[6].mxu1 }
 0x351   : > { %v1377_v22 = vadd.f32 %v4025_v21, %v3334_v20  ;;  %v1371_v23 = vpop.f32.mrb[7].mxu1 }
 0x352   : > { %v1372_v24 = vadd.f32 %v3334_v20, %v1371_v23  ;;  %v3310_v20 = vld [vmem:[%s6247_s5 + $0xd8] sm:$0xff]  ;;  %v3312_v23 = vld [vmem:[%s6247_s5 + $0xe8] sm:$0xff] }
 0x353   : > { %v4480_v21 = vpack.c.bf16 %v3310_v20, %v3309_v17  ;;  %v3368_v17 = vld [vmem:[%s6247_s5 + $0x108] sm:$0xff] }
 0x354   : > { %v5653_v25 = vpack.c.bf16 %v1377_v22, %v1372_v24  ;;  %v3311_v22 = vld [vmem:[%s6247_s5 + $0xe0] sm:$0xff] }
 0x355   : > { %v4484_v24 = vpack.c.bf16 %v3312_v23, %v3311_v22  ;;  %v3370_v22 = vld [vmem:[%s6247_s5 + $0x118] sm:$0xff] }
 0x370   : > { %v4096_v27 = vpop.f32.mrb[8].mxu1 }
 0x371   : > { %v5661_v28 = vadd.f32 %v4096_v27, %v5658_v26  ;;  %v5663_v29 = vpop.f32.mrb[9].mxu1  ;;  %v3313_v27 = vld [vmem:[%s6247_s5 + $0xf0] sm:$0xff] }
 0x390   : > { %v4166_v31 = vpop.f32.mrb[10].mxu1 }
 0x391   : > { %v2034_v32 = vadd.f32 %v4166_v31, %v3402_v30  ;;  %v2028_v33 = vpop.f32.mrb[11].mxu1 }
 0x392   : > { %v2029_v34 = vadd.f32 %v3402_v30, %v2028_v33  ;;  %v3314_v30 = vld [vmem:[%s6247_s5 + $0xf8] sm:$0xff] }
 0x393   : > { %v4488_v31 = vpack.c.bf16 %v3314_v30, %v3313_v27  ;;  %v3372_v27 = vld [vmem:[%s6247_s5 + $0x128] sm:$0xff] }
 0x394   : > { %v5668_v35 = vpack.c.bf16 %v2034_v32, %v2029_v34  ;;  %v1172_v32 = vadd.f32 %v5643_v16, %v5648_v19 }
 0x39f   : > { %v978_v36 = vpop.xlane.xlu1 %977 }
 0x3a0   : > { %v980_v37 = vsub.f32 %v3913_v11, %v978_v36  ;;  %v975_v38 = vpop.xlane.xlu0 %974  ;;  %v4472_v11 = vpack.c.bf16 %v3306_v10, %v3305_v8  ;;  %v3316_v36 = vld [vmem:[%s6248_s6 + $0x1] ss:$0 sm:$0xff]  ;;  %v1078_v8 = vld [vmem:[%s6251_s9 + $0x10] sm:$0xff]  ;;  %v1079_v10 = vld [vmem:[%s6251_s9 + $0x18] sm:$0xff] }
 0x3a1   : > { %v979_v39 = vsub.f32 %v963_v12, %v975_v38  ;;  %v3307_v12 = vld [vmem:[%s6247_s5 + $0xc0] sm:$0xff] }
 0x3a2   : > { %v983_v40 = vmul.f32 1.442695, %v980_v37  ;;  %v4476_v15 = vpack.c.bf16 %v3308_v13, %v3307_v12  ;;  %v4546_v13 = vpack.c.bf16 %v1079_v10, %v1078_v8  ;;  %v3412_v8 = vld [vmem:[%s6251_s9 + $0x58] sm:$0xff] }
 0x3a3   : > { %v981_v41 = vmul.f32 1.442695, %v979_v39 }
 0x3a4   : > { %4894 = vpow2.f32 %v983_v40 }
 0x3a5   : > { %4896 = vpow2.f32 %v981_v41 }
 0x3ae   : > { %v4895_v42 = vpop.eup %4894 }
 0x3af   : > { %v4897_v44 = vpop.eup %4896  ;;  %v988_v46 = vsel %vm972_vm2, %v4895_v42, 0.0 }
 0x3b0   : > { %989 = vadd.xlane.f32.xlu1 %v988_v46  ;;  %v4226_v47 = vpop.f32.mrb[12].mxu1  ;;  %v985_v48 = vsel %vm972_vm2, %v4897_v44, 0.0 }
 0x3b1   : > { %v5678_v49 = vadd.f32 %v4226_v47, %v5673_v43  ;;  %v5680_v50 = vpop.f32.mrb[13].mxu1  ;;  %986 = vadd.xlane.f32.xlu0 %v985_v48 }
 0x3d0   : > { %v4296_v55 = vpop.f32.mrb[14].mxu1 }
 0x3d1   : > { %v2612_v56 = vadd.f32 %v4296_v55, %v3468_v54  ;;  %v2606_v57 = vpop.f32.mrb[15].mxu1 }
 0x3d2   : > { %v2607_v58 = vadd.f32 %v3468_v54, %v2606_v57  ;;  %v3342_v57 = vld [vmem:[%s6251_s9 + $0x28] sm:$0xff] }
 0x3d4   : > { %v5691_v59 = vpack.c.bf16 %v2612_v56, %v2607_v58  ;;  %v3341_v56 = vld [vmem:[%s6251_s9 + $0x20] sm:$0xff] }
 0x3d5   : > { %v4534_v58 = vpack.c.bf16 %v3342_v57, %v3341_v56 }
 0x43d   : > { %v990_v60 = vpop.xlane.xlu1 %989 }
 0x43e   : > { %4898 = vrcp.f32 %v990_v60  ;;  %v987_v61 = vpop.xlane.xlu0 %986 }
 0x43f   : > { %4900 = vrcp.f32 %v987_v61 }
 0x448   : > { %v4899_v62 = vpop.eup %4898 }
 0x449   : > { %v4901_v1 = vpop.eup %4900  ;;  %v994_v3 = vmul.f32 %v4899_v62, %v4895_v42 }
 0x44a   : > { %v993_v2 = vmul.f32 %v4901_v1, %v4897_v44 }
 0x44c   : > { %3918 = vmatprep.mubr.msk.f32.mxu0 %vm972_vm2, %v993_v2 }
 0x44d   : > { %3919 = vmatmul.mubr.msk.f32.vlgmr.msra.gmra.mrb[4].mxu0 %vm972_vm2, %v994_v3 }
 0x44e   : > { %4463 = vmatpush3.bf16.msra.mxu0 %v4460_v53  ;;  %3988 = vmatprep.mubr.f32.mxu0 %v5264_v9 }
 0x44f   : > { %4465 = vmatprep.subr.bf16.mxu0 %v4464_v4 }
 0x452   : > { %4467 = vmatpush3.bf16.msra.mxu0 %v4464_v4  ;;  %v4538_v4 = vpack.c.bf16 %v3344_v0, %v3343_v63 }
 0x453   : > { %4469 = vmatprep.subr.bf16.mxu0 %v4468_v7 }
 0x456   : > { %4471 = vmatpush3.bf16.msra.mxu0 %v4468_v7  ;;  %v4542_v7 = vpack.c.bf16 %v1077_v6, %v1076_v5 }
 0x457   : > { %4473 = vmatprep.subr.bf16.mxu0 %v4472_v11 }
 0x45a   : > { %4475 = vmatpush3.bf16.msra.mxu0 %v4472_v11 }
 0x45b   : > { %4477 = vmatprep.subr.bf16.mxu0 %v4476_v15 }
 0x45e   : > { %4479 = vmatpush3.bf16.msra.mxu0 %v4476_v15  ;;  %v3367_v15 = vld [vmem:[%s6247_s5 + $0x100] sm:$0xff] }
 0x45f   : > { %4481 = vmatprep.subr.bf16.mxu0 %v4480_v21  ;;  %v4582_v20 = vpack.c.bf16 %v3368_v17, %v3367_v15  ;;  %v3433_v15 = vld [vmem:[%s6247_s5 + $0x180] sm:$0xff]  ;;  %v3434_v17 = vld [vmem:[%s6247_s5 + $0x188] sm:$0xff] }
 0x462   : > { %4483 = vmatpush3.bf16.msra.mxu0 %v4480_v21  ;;  %v3369_v21 = vld [vmem:[%s6247_s5 + $0x110] sm:$0xff] }
 0x463   : > { %4485 = vmatprep.subr.bf16.mxu0 %v4484_v24  ;;  %v4586_v23 = vpack.c.bf16 %v3370_v22, %v3369_v21  ;;  %v3435_v21 = vld [vmem:[%s6247_s5 + $0x190] sm:$0xff]  ;;  %v3436_v22 = vld [vmem:[%s6247_s5 + $0x198] sm:$0xff] }
 0x466   : > { %4487 = vmatpush3.bf16.msra.mxu0 %v4484_v24  ;;  %v3371_v24 = vld [vmem:[%s6247_s5 + $0x120] sm:$0xff] }
 0x467   : > { %4489 = vmatprep.subr.bf16.mxu0 %v4488_v31  ;;  %v4590_v30 = vpack.c.bf16 %v3372_v27, %v3371_v24  ;;  %v4700_v27 = vpack.c.bf16 %v3436_v22, %v3435_v21 }
 0x46a   : > { %4491 = vmatpush3.bf16.msra.mxu0 %v4488_v31  ;;  %v3373_v31 = vld [vmem:[%s6247_s5 + $0x130] sm:$0xff] }
 0x46d   : > { %3989 = vmatmul.mubr.f32.vlgmr.msra.gmra.mrb[6].mxu0 %v5275_v14 }
 0x46e   : > { %4030 = vmatprep.mubr.msk.f32.mxu0 %vm884_vm0, %v1172_v32  ;;  %v3374_v32 = vld [vmem:[%s6247_s5 + $0x138] sm:$0xff] }
 0x520   : > { %v5742_v33 = vpop.f32.mrb[4].mxu0 }
 0x521   : > { %v5744_v34 = vpop.f32.mrb[5].mxu0 }
 0x540   : > { %v3990_v37 = vpop.f32.mrb[6].mxu0 }
 0x541   : > { %v1277_v38 = vadd.f32 %v3990_v37, %v3316_v36  ;;  %v1271_v39 = vpop.f32.mrb[7].mxu0 }
 0x542   : > { %v1272_v40 = vadd.f32 %v3316_v36, %v1271_v39  ;;  %v3376_v36 = vld [vmem:[%s6247_s5 + $0x148] sm:$0xff]  ;;  %v3378_v39 = vld [vmem:[%s6247_s5 + $0x158] sm:$0xff] }
 0x544   : > { %v4524_v41 = vpack.c.bf16 %v1277_v38, %v1272_v40  ;;  %v3377_v38 = vld [vmem:[%s6247_s5 + $0x150] sm:$0xff] }
 0x545   : > { %v4602_v40 = vpack.c.bf16 %v3378_v39, %v3377_v38  ;;  %v3443_v39 = vld [vmem:[%s6247_s5 + $0x1d0] sm:$0xff] }
 0x546   : > { %4526 = vmatprep.subr.msk.bf16.mxu0 %vm5331_vm1, %v4524_v41 }
 0x547   : > { %4529 = vmatpush3.bf16.xpose.msk.msra.mxu0 %vm5331_vm1, %v4524_v41  ;;  %v3379_v41 = vld [vmem:[%s6247_s5 + $0x160] sm:$0xff] }
 0x548   : > { %4531 = vmatprep.subr.bf16.mxu0 %v5653_v25 }
 0x54e   : > { %4031 = vmatmul.mubr.msk.f32.vlgmr.msra.gmra.mrb[8].mxu0 %vm884_vm0, %v5646_v18 }
 0x54f   : > { %4533 = vmatpush3.bf16.msra.mxu0 %v5653_v25 }
 0x550   : > { %4535 = vmatprep.subr.bf16.mxu0 %v4534_v58 }
 0x621   : > { %v4032_v16 = vpop.f32.mrb[8].mxu0 }
 0x622   : > { %v1458_v19 = vpop.f32.mrb[9].mxu0  ;;  %v1470_v42 = vsel %vm972_vm2, %v4032_v16, -inf }
 0x623   : > { %1471 = vmax.xlane.f32.xlu1 %v1470_v42  ;;  %v1467_v44 = vsel %vm972_vm2, %v1458_v19, -inf  ;;  %v3381_v42 = vld [vmem:[%s6247_s5 + $0x170] sm:$0xff] }
 0x624   : > { %1468 = vmax.xlane.f32.xlu0 %v1467_v44  ;;  %v3382_v44 = vld [vmem:[%s6247_s5 + $0x178] sm:$0xff] }
 0x6b0   : > { %v1472_v46 = vpop.xlane.xlu1 %1471 }
 0x6b1   : > { %v1474_v47 = vsub.f32 %v4032_v16, %v1472_v46  ;;  %v1469_v48 = vpop.xlane.xlu0 %1468  ;;  %v3380_v16 = vld [vmem:[%s6247_s5 + $0x168] sm:$0xff]  ;;  %v4610_v46 = vpack.c.bf16 %v3382_v44, %v3381_v42  ;;  %v3447_v44 = vld [vmem:[%s6247_s5 + $0x1f0] sm:$0xff] }
 0x6b2   : > { %v1473_v51 = vsub.f32 %v1458_v19, %v1469_v48  ;;  %v4606_v19 = vpack.c.bf16 %v3380_v16, %v3379_v41  ;;  %v3384_v48 = vld [vmem:[%s6248_s6 + $0x2] ss:$0 sm:$0xff] }
 0x6b3   : > { %v1477_v52 = vmul.f32 1.442695, %v1474_v47  ;;  %v1829_v47 = vadd.f32 %v5658_v26, %v5663_v29  ;;  %v3445_v16 = vld [vmem:[%s6247_s5 + $0x1e0] sm:$0xff] }
 0x6b4   : > { %v1475_v53 = vmul.f32 1.442695, %v1473_v51 }
 0x6b5   : > { %4902 = vpow2.f32 %v1477_v52 }
 0x6b6   : > { %4904 = vpow2.f32 %v1475_v53 }
 0x6bf   : > { %v4903_v54 = vpop.eup %4902 }
 0x6c0   : > { %v4905_v18 = vpop.eup %4904  ;;  %v1482_v25 = vsel %vm972_vm2, %v4903_v54, 0.0 }
 0x6c1   : > { %1483 = vadd.xlane.f32.xlu1 %v1482_v25  ;;  %v1479_v55 = vsel %vm972_vm2, %v4905_v18, 0.0 }
 0x6c2   : > { %1480 = vadd.xlane.f32.xlu0 %v1479_v55 }
 0x74e   : > { %v1484_v60 = vpop.xlane.xlu1 %1483 }
 0x74f   : > { %4906 = vrcp.f32 %v1484_v60  ;;  %v1481_v61 = vpop.xlane.xlu0 %1480 }
 0x750   : > { %4908 = vrcp.f32 %v1481_v61 }
 0x759   : > { %v4907_v62 = vpop.eup %4906 }
 0x75a   : > { %v4909_v1 = vpop.eup %4908  ;;  %v1488_v3 = vmul.f32 %v4907_v62, %v4903_v54 }
 0x75b   : > { %v1487_v2 = vmul.f32 %v4909_v1, %v4905_v18  ;;  %v3409_v1 = vld [vmem:[%s6251_s9 + $0x40] sm:$0xff] }
 0x75d   : > { %4037 = vmatprep.mubr.msk.f32.mxu0 %vm972_vm2, %v1487_v2  ;;  %v3410_v2 = vld [vmem:[%s6251_s9 + $0x48] sm:$0xff] }
 0x75e   : > { %4038 = vmatmul.mubr.msk.f32.vlgmr.msra.gmra.mrb[10].mxu0 %vm972_vm2, %v1488_v3  ;;  %v4656_v3 = vpack.c.bf16 %v3410_v2, %v3409_v1  ;;  %v3477_v2 = vld [vmem:[%s6251_s9 + $0x70] sm:$0xff] }
 0x75f   : > { %4537 = vmatpush3.bf16.msra.mxu0 %v4534_v58 }
 0x760   : > { %4539 = vmatprep.subr.bf16.mxu0 %v4538_v4 }
 0x763   : > { %4541 = vmatpush3.bf16.msra.mxu0 %v4538_v4 }
 0x764   : > { %4543 = vmatprep.subr.bf16.mxu0 %v4542_v7 }
 0x831   : > { %v4039_v11 = vpop.f32.mrb[10].mxu0 }
 0x832   : > { %v1561_v12 = vpop.f32.mrb[11].mxu0 }
 0x833   : > { %4048 = vmatprep.mubr.msk.f32.mxu0 %vm884_vm0, %v1561_v12 }
 0x834   : > { %4049 = vmatmul.mubr.msk.f32.vlgmr.msra.gmra.mrb[12].mxu0 %vm884_vm0, %v4039_v11 }
 0x835   : > { %4545 = vmatpush3.bf16.msra.mxu0 %v4542_v7  ;;  %4059 = vmatprep.mubr.msk.f32.mxu0 %vm884_vm0, %v5744_v34  ;;  %v4594_v34 = vpack.c.bf16 %v3374_v32, %v3373_v31  ;;  %v3411_v7 = vld [vmem:[%s6251_s9 + $0x50] sm:$0xff]  ;;  %v3438_v31 = vld [vmem:[%s6247_s5 + $0x1a8] sm:$0xff] }
 0x836   : > { %4547 = vmatprep.subr.bf16.mxu0 %v4546_v13 }
 0x839   : > { %4549 = vmatpush3.bf16.msra.mxu0 %v4546_v13  ;;  %v4660_v13 = vpack.c.bf16 %v3412_v8, %v3411_v7 }
 0x83a   : > { %4583 = vmatprep.subr.bf16.mxu0 %v4582_v20 }
 0x83c   : > { %4060 = vmatmul.mubr.msk.f32.vlgmr.msra.gmra.mrb[12].mxu0 %vm884_vm0, %v5742_v33  ;;  %v3375_v33 = vld [vmem:[%s6247_s5 + $0x140] sm:$0xff] }
 0x83d   : > { %4585 = vmatpush3.bf16.msra.mxu0 %v4582_v20  ;;  %4129 = vmatprep.mubr.f32.mxu0 %v5264_v9  ;;  %v4598_v37 = vpack.c.bf16 %v3376_v36, %v3375_v33  ;;  %v4696_v20 = vpack.c.bf16 %v3434_v17, %v3433_v15  ;;  %v3440_v33 = vld [vmem:[%s6247_s5 + $0x1b8] sm:$0xff] }
 0x83e   : > { %4587 = vmatprep.subr.bf16.mxu0 %v4586_v23 }
 0x841   : > { %4589 = vmatpush3.bf16.msra.mxu0 %v4586_v23 }
 0x842   : > { %4591 = vmatprep.subr.bf16.mxu0 %v4590_v30 }
 0x845   : > { %4593 = vmatpush3.bf16.msra.mxu0 %v4590_v30  ;;  %v3437_v30 = vld [vmem:[%s6247_s5 + $0x1a0] sm:$0xff] }
 0x846   : > { %4595 = vmatprep.subr.bf16.mxu0 %v4594_v34  ;;  %v4704_v32 = vpack.c.bf16 %v3438_v31, %v3437_v30  ;;  %v2944_v30 = vld [vmem:[%s6255_s13] sm:$0xff] }
 0x849   : > { %4597 = vmatpush3.bf16.msra.mxu0 %v4594_v34  ;;  %v3439_v34 = vld [vmem:[%s6247_s5 + $0x1b0] sm:$0xff] }
 0x84a   : > { %4599 = vmatprep.subr.bf16.mxu0 %v4598_v37  ;;  %v4708_v36 = vpack.c.bf16 %v3440_v33, %v3439_v34  ;;  %v2949_v34 = vld [vmem:[%s6255_s13 + $0x28] sm:$0xff]  ;;  %v2951_v33 = vld [vmem:[%s6255_s13 + $0x38] sm:$0xff] }
 0x84d   : > { %4601 = vmatpush3.bf16.msra.mxu0 %v4598_v37  ;;  %v3441_v37 = vld [vmem:[%s6247_s5 + $0x1c0] sm:$0xff] }
 0x84e   : > { %4603 = vmatprep.subr.bf16.mxu0 %v4602_v40 }
 0x851   : > { %4605 = vmatpush3.bf16.msra.mxu0 %v4602_v40  ;;  %v3444_v40 = vld [vmem:[%s6247_s5 + $0x1d8] sm:$0xff] }
 0x852   : > { %4607 = vmatprep.subr.bf16.mxu0 %v4606_v19  ;;  %v4716_v41 = vpack.c.bf16 %v3444_v40, %v3443_v39  ;;  %v2953_v39 = vld [vmem:[%s6255_s13 + $0x48] sm:$0xff]  ;;  %v2955_v40 = vld [vmem:[%s6255_s13 + $0x58] sm:$0xff] }
 0x855   : > { %4609 = vmatpush3.bf16.msra.mxu0 %v4606_v19  ;;  %v3446_v19 = vld [vmem:[%s6247_s5 + $0x1e8] sm:$0xff] }
 0x856   : > { %4611 = vmatprep.subr.bf16.mxu0 %v4610_v46  ;;  %v4720_v42 = vpack.c.bf16 %v3446_v19, %v3445_v16  ;;  %v4786_v16 = vpack.c.bf16 %v2955_v40, %v2953_v39  ;;  %v2952_v19 = vld [vmem:[%s6255_s13 + $0x40] sm:$0xff]  ;;  %v3074_v39 = vld [vmem:[%s6257_s15 + $0x28] sm:$0xff]  ;;  %v3091_v40 = vld [vmem:[%s6257_s15 + $0xb0] sm:$0xff] }
 0x859   : > { %4613 = vmatpush3.bf16.msra.mxu0 %v4610_v46  ;;  %v3448_v46 = vld [vmem:[%s6247_s5 + $0x1f8] sm:$0xff] }
 0x85c   : > { %4130 = vmatmul.mubr.f32.vlgmr.msra.gmra.mrb[14].mxu0 %v5275_v14 }
 0x85d   : > { %4171 = vmatprep.mubr.msk.f32.mxu0 %vm884_vm0, %v1829_v47  ;;  %v4724_v47 = vpack.c.bf16 %v3448_v46, %v3447_v44 }
 0x92f   : > { %v4131_v51 = vpop.f32.mrb[14].mxu0 }
 0x930   : > { %v1934_v52 = vadd.f32 %v4131_v51, %v3384_v48  ;;  %v1928_v53 = vpop.f32.mrb[15].mxu0  ;;  %v3450_v51 = vld [vmem:[%s6248_s6 + $0x3] ss:$0 sm:$0xff] }
 0x931   : > { %v1929_v54 = vadd.f32 %v3384_v48, %v1928_v53  ;;  %v2407_v48 = vadd.f32 %v5673_v43, %v5680_v50 }
 0x933   : > { %v4646_v18 = vpack.c.bf16 %v1934_v52, %v1929_v54 }
 0x935   : > { %4648 = vmatprep.subr.msk.bf16.mxu0 %vm5331_vm1, %v4646_v18 }
 0x936   : > { %4651 = vmatpush3.bf16.xpose.msk.msra.mxu0 %vm5331_vm1, %v4646_v18 }
 0x937   : > { %4653 = vmatprep.subr.bf16.mxu0 %v5668_v35 }
 0x93d   : > { %4172 = vmatmul.mubr.msk.f32.vlgmr.msra.gmra.mrb[16].mxu0 %vm884_vm0, %v5661_v28 }
 0x93e   : > { %4655 = vmatpush3.bf16.msra.mxu0 %v5668_v35 }
 0x93f   : > { %4657 = vmatprep.subr.bf16.mxu0 %v4656_v3 }
 0xa10   : > { %v4173_v26 = vpop.f32.mrb[16].mxu0 }
 0xa11   : > { %v2115_v29 = vpop.f32.mrb[17].mxu0  ;;  %v2127_v25 = vsel %vm972_vm2, %v4173_v26, -inf }
 0xa12   : > { %2128 = vmax.xlane.f32.xlu1 %v2127_v25  ;;  %v2124_v55 = vsel %vm972_vm2, %v2115_v29, -inf }
 0xa13   : > { %2125 = vmax.xlane.f32.xlu0 %v2124_v55 }
 0xa9f   : > { %v2129_v56 = vpop.xlane.xlu1 %2128 }
 0xaa0   : > { %v2131_v57 = vsub.f32 %v4173_v26, %v2129_v56  ;;  %v2126_v58 = vpop.xlane.xlu0 %2125 }
 0xaa1   : > { %v2130_v60 = vsub.f32 %v2115_v29, %v2126_v58 }
 0xaa2   : > { %v2134_v61 = vmul.f32 1.442695, %v2131_v57 }
 0xaa3   : > { %v2132_v62 = vmul.f32 1.442695, %v2130_v60 }
 0xaa4   : > { %4910 = vpow2.f32 %v2134_v61 }
 0xaa5   : > { %4912 = vpow2.f32 %v2132_v62  ;;  %v3475_v62 = vld [vmem:[%s6251_s9 + $0x60] sm:$0xff] }
 0xaae   : > { %v4911_v63 = vpop.eup %4910 }
 0xaaf   : > { %v4913_v28 = vpop.eup %4912  ;;  %v2139_v35 = vsel %vm972_vm2, %v4911_v63, 0.0 }
 0xab0   : > { %2140 = vadd.xlane.f32.xlu1 %v2139_v35  ;;  %v2136_v0 = vsel %vm972_vm2, %v4913_v28, 0.0 }
 0xab1   : > { %2137 = vadd.xlane.f32.xlu0 %v2136_v0 }
 0xb3d   : > { %v2141_v4 = vpop.xlane.xlu1 %2140 }
 0xb3e   : > { %4914 = vrcp.f32 %v2141_v4  ;;  %v2138_v5 = vpop.xlane.xlu0 %2137 }
 0xb3f   : > { %4916 = vrcp.f32 %v2138_v5 }
 0xb48   : > { %v4915_v6 = vpop.eup %4914 }
 0xb49   : > { %v4917_v10 = vpop.eup %4916  ;;  %v2145_v12 = vmul.f32 %v4915_v6, %v4911_v63  ;;  %v3476_v63 = vld [vmem:[%s6251_s9 + $0x68] sm:$0xff] }
 0xb4a   : > { %v2144_v11 = vmul.f32 %v4917_v10, %v4913_v28  ;;  %v4770_v28 = vpack.c.bf16 %v3476_v63, %v3475_v62  ;;  %v2966_v63 = vld [vmem:[%s6255_s13 + $0xb0] sm:$0xff] }
 0xb4c   : > { %4178 = vmatprep.mubr.msk.f32.mxu0 %vm972_vm2, %v2144_v11 }
 0xb4d   : > { %4179 = vmatmul.mubr.msk.f32.vlgmr.msra.gmra.mrb[18].mxu0 %vm972_vm2, %v2145_v12  ;;  %v3481_v12 = vld [vmem:[%s6252_s10] ss:$0 sm:$0xff] }
 0xb4e   : > { %4659 = vmatpush3.bf16.msra.mxu0 %v4656_v3  ;;  %v3478_v3 = vld [vmem:[%s6251_s9 + $0x78] sm:$0xff] }
 0xb4f   : > { %4661 = vmatprep.subr.bf16.mxu0 %v4660_v13  ;;  %v4774_v7 = vpack.c.bf16 %v3478_v3, %v3477_v2  ;;  %v2968_v3 = vld [vmem:[%s6255_s13 + $0xc0] sm:$0xff] }
 0xb52   : > { %4663 = vmatpush3.bf16.msra.mxu0 %v4660_v13  ;;  %v4930_v13 = vld [vmem:[%s5143_s18 + $0x8] sm:$0xff] }
 0xb53   : > { %4697 = vmatprep.subr.bf16.mxu0 %v4696_v20 }
 0xc20   : > { %v4180_v23 = vpop.f32.mrb[18].mxu0 }
 0xc21   : > { %v2218_v24 = vpop.f32.mrb[19].mxu0 }
 0xc22   : > { %4189 = vmatprep.mubr.msk.f32.mxu0 %vm884_vm0, %v2218_v24  ;;  %v2945_v24 = vld [vmem:[%s6255_s13 + $0x8] sm:$0xff] }
 0xc23   : > { %4190 = vmatmul.mubr.msk.f32.vlgmr.msra.gmra.mrb[12].mxu0 %vm884_vm0, %v4180_v23 }
 0xc24   : > { %4699 = vmatpush3.bf16.msra.mxu0 %v4696_v20  ;;  %4259 = vmatprep.mubr.f32.mxu0 %v5264_v9  ;;  %v3442_v9 = vld [vmem:[%s6247_s5 + $0x1c8] sm:$0xff]  ;;  %v4931_v20 = vld [vmem:[%s5143_s18] sm:$0xff]  ;;  %s541_s18 = scalar_lea.vmem [#allocation2], %s3267_s0 }
 0xc25   : > { %4701 = vmatprep.subr.bf16.mxu0 %v4700_v27  ;;  %v4712_v38 = vpack.c.bf16 %v3442_v9, %v3441_v37  ;;  %v4782_v37 = vpack.c.bf16 %v2951_v33, %v2949_v34  ;;  %v2948_v9 = vld [vmem:[%s6255_s13 + $0x20] sm:$0xff]  ;;  %v3072_v34 = vld [vmem:[%s6257_s15 + $0x18] sm:$0xff]  ;;  %s3201_s19 = sshll.u32 %s541_s18, 4  ;;  %s6193_s19 = int_to_ptr.vmem [resolvable:$true] %s3201_s19 }
 0xc26   : > { %v3089_v33 = vld [vmem:[%s6257_s15 + $0xa0] sm:$0xff]  ;;  %s4932_s23 = scalar_lea.vmem %s6193_s19, 256  ;;  %p4939_p0 = scmp.lt.s32.totalorder %s6193_s19, %s4937_s30 }
 0xc27   : > { %p4933_p11 = scmp.ne.s32.totalorder %s6193_s19, %s4932_s23  ;;  %p4940_p1 = scmp.lt.s32.totalorder %s4938_s26, %s4932_s23 }
 0xc28   : > { %4703 = vmatpush3.bf16.msra.mxu0 %v4700_v27  ;;  %v2947_v27 = vld [vmem:[%s6255_s13 + $0x18] sm:$0xff] }
 0xc29   : > { %4705 = vmatprep.subr.bf16.mxu0 %v4704_v32  ;;  %v4778_v31 = vpack.c.bf16 %v2947_v27, %v2945_v24  ;;  %v3087_v24 = vld [vmem:[%s6257_s15 + $0x90] sm:$0xff]  ;;  %v3088_v27 = vld [vmem:[%s6257_s15 + $0x98] sm:$0xff]  ;;  %p4934_p12 = pnand %p4933_p11, %p5128_p5  ;;  %p4941_p2 = por %p4940_p1, %p4939_p0 }
 0xc2b   : > { %p4935_p13 = pneg %p4934_p12 }
 0xc2c   : > { %4707 = vmatpush3.bf16.msra.mxu0 %v4704_v32  ;;  %v2946_v32 = vld [vmem:[%s6255_s13 + $0x10] sm:$0xff] }
 0xc2d   : > { %4709 = vmatprep.subr.bf16.mxu0 %v4708_v36  ;;  %p4942_p3 = pnand %p4941_p2, %p4935_p13 }
 0xc30   : > { %4711 = vmatpush3.bf16.msra.mxu0 %v4708_v36  ;;  %v4780_v36 = vpack.c.bf16 %v2946_v32, %v2944_v30  ;;  %v3071_v32 = vld [vmem:[%s6257_s15 + $0x10] sm:$0xff] }
 0xc31   : > { %4713 = vmatprep.subr.bf16.mxu0 %v4712_v38 }
 0xc34   : > { %4715 = vmatpush3.bf16.msra.mxu0 %v4712_v38  ;;  %v2950_v38 = vld [vmem:[%s6255_s13 + $0x30] sm:$0xff] }
 0xc35   : > { %4717 = vmatprep.subr.bf16.mxu0 %v4716_v41 }
 0xc38   : > { %4719 = vmatpush3.bf16.msra.mxu0 %v4716_v41  ;;  %v4784_v41 = vpack.c.bf16 %v2950_v38, %v2948_v9  ;;  %v3073_v38 = vld [vmem:[%s6257_s15 + $0x20] sm:$0xff] }
 0xc39   : > { %4721 = vmatprep.subr.bf16.mxu0 %v4720_v42 }
 0xc3c   : > { %4723 = vmatpush3.bf16.msra.mxu0 %v4720_v42  ;;  %v2954_v42 = vld [vmem:[%s6255_s13 + $0x50] sm:$0xff] }
 0xc3d   : > { %4725 = vmatprep.subr.bf16.mxu0 %v4724_v47  ;;  %v4788_v44 = vpack.c.bf16 %v2954_v42, %v2952_v19  ;;  %v3075_v42 = vld [vmem:[%s6257_s15 + $0x30] sm:$0xff] }
 0xc40   : > { %4727 = vmatpush3.bf16.msra.mxu0 %v4724_v47 }
 0xc43   : > { %4260 = vmatmul.mubr.f32.vlgmr.msra.gmra.mrb[20].mxu0 %v5275_v14 }
 0xc44   : > { %4301 = vmatprep.mubr.msk.f32.mxu0 %vm884_vm0, %v2407_v48 }
 0xd16   : > { %v4261_v52 = vpop.f32.mrb[20].mxu0 }
 0xd17   : > { %v2512_v53 = vadd.f32 %v4261_v52, %v3450_v51  ;;  %v2506_v54 = vpop.f32.mrb[21].mxu0 }
 0xd18   : > { %v2507_v18 = vadd.f32 %v3450_v51, %v2506_v54 }
 0xd1a   : > { %v4760_v26 = vpack.c.bf16 %v2512_v53, %v2507_v18 }
 0xd1c   : > { %4762 = vmatprep.subr.msk.bf16.mxu0 %vm5331_vm1, %v4760_v26 }
 0xd1d   : > { %4765 = vmatpush3.bf16.xpose.msk.msra.mxu0 %vm5331_vm1, %v4760_v26  ;;  %v2957_v26 = vld [vmem:[%s6255_s13 + $0x68] sm:$0xff] }
 0xd1e   : > { %4767 = vmatprep.subr.bf16.mxu0 %v5691_v59 }
 0xd24   : > { %4302 = vmatmul.mubr.msk.f32.vlgmr.msra.gmra.mrb[22].mxu0 %vm884_vm0, %v5678_v49 }
 0xd25   : > { %4769 = vmatpush3.bf16.msra.mxu0 %v5691_v59 }
 0xd26   : > { %4771 = vmatprep.subr.bf16.mxu0 %v4770_v28 }
 0xdf7   : > { %v4303_v14 = vpop.f32.mrb[22].mxu0 }
 0xdf8   : > { %v2693_v43 = vpop.f32.mrb[23].mxu0  ;;  %v2705_v50 = vsel %vm972_vm2, %v4303_v14, -inf }
 0xdf9   : > { %2706 = vmax.xlane.f32.xlu1 %v2705_v50  ;;  %v2702_v29 = vsel %vm972_vm2, %v2693_v43, -inf  ;;  %v2956_v50 = vld [vmem:[%s6255_s13 + $0x60] sm:$0xff] }
 0xdfa   : > { %2703 = vmax.xlane.f32.xlu0 %v2702_v29  ;;  %v2958_v29 = vld [vmem:[%s6255_s13 + $0x70] sm:$0xff] }
 0xe86   : > { %v2707_v25 = vpop.xlane.xlu1 %2706 }
 0xe87   : > { %v2709_v55 = vsub.f32 %v4303_v14, %v2707_v25  ;;  %v2704_v56 = vpop.xlane.xlu0 %2703  ;;  %v2959_v14 = vld [vmem:[%s6255_s13 + $0x78] sm:$0xff]  ;;  %v4792_v25 = vpack.c.bf16 %v2958_v29, %v2956_v50  ;;  %v3079_v29 = vld [vmem:[%s6257_s15 + $0x50] sm:$0xff] }
 0xe88   : > { %v2708_v45 = vsub.f32 %v2693_v43, %v2704_v56  ;;  %v4790_v43 = vpack.c.bf16 %v2959_v14, %v2957_v26  ;;  %v2963_v56 = vld [vmem:[%s6255_s13 + $0x98] sm:$0xff]  ;;  %v3095_v26 = vld [vmem:[%s6257_s15 + $0xd0] sm:$0xff] }
 0xe89   : > { %v2712_v57 = vmul.f32 1.442695, %v2709_v55  ;;  %v2961_v55 = vld [vmem:[%s6255_s13 + $0x88] sm:$0xff]  ;;  %v3096_v14 = vld [vmem:[%s6257_s15 + $0xd8] sm:$0xff] }
 0xe8a   : > { %v2710_v58 = vmul.f32 1.442695, %v2708_v45  ;;  %v4794_v45 = vpack.c.bf16 %v2963_v56, %v2961_v55  ;;  %v4830_v50 = vpack.c.bf16 %v3096_v14, %v3095_v26  ;;  %v3097_v55 = vld [vmem:[%s6257_s15 + $0xe0] sm:$0xff]  ;;  %v3098_v56 = vld [vmem:[%s6257_s15 + $0xe8] sm:$0xff] }
 0xe8b   : > { %4918 = vpow2.f32 %v2712_v57  ;;  %v2960_v57 = vld [vmem:[%s6255_s13 + $0x80] sm:$0xff] }
 0xe8c   : > { %4920 = vpow2.f32 %v2710_v58  ;;  %v2962_v58 = vld [vmem:[%s6255_s13 + $0x90] sm:$0xff] }
 0xe95   : > { %v4919_v60 = vpop.eup %4918 }
 0xe96   : > { %v4921_v49 = vpop.eup %4920  ;;  %v2717_v59 = vsel %vm972_vm2, %v4919_v60, 0.0 }
 0xe97   : > { %2718 = vadd.xlane.f32.xlu1 %v2717_v59  ;;  %v2714_v61 = vsel %vm972_vm2, %v4921_v49, 0.0  ;;  %v2967_v59 = vld [vmem:[%s6255_s13 + $0xb8] sm:$0xff] }
 0xe98   : > { %2715 = vadd.xlane.f32.xlu0 %v2714_v61  ;;  %v2964_v61 = vld [vmem:[%s6255_s13 + $0xa0] sm:$0xff] }
 0xf24   : > { %v2719_v35 = vpop.xlane.xlu1 %2718 }
 0xf25   : > { %4922 = vrcp.f32 %v2719_v35  ;;  %v2716_v0 = vpop.xlane.xlu0 %2715  ;;  %v2971_v35 = vld [vmem:[%s6255_s13 + $0xd8] sm:$0xff] }
 0xf26   : > { %4924 = vrcp.f32 %v2716_v0  ;;  %v4996_v0 = vmov 0.0  }
 0xf2f   : > { %v4923_v1 = vpop.eup %4922 }
 0xf30   : > { %v4925_v4 = vpop.eup %4924  ;;  %v2723_v6 = vmul.f32 %v4923_v1, %v4919_v60  ;;  %v4796_v60 = vpack.c.bf16 %v2962_v58, %v2960_v57  ;;  %v4800_v1 = vpack.c.bf16 %v2966_v63, %v2964_v61  ;;  %v4834_v57 = vpack.c.bf16 %v3098_v56, %v3097_v55 }
 0xf31   : > { %v2722_v5 = vmul.f32 %v4925_v4, %v4921_v49  ;;  %v2965_v49 = vld [vmem:[%s6255_s13 + $0xa8] sm:$0xff]  ;;  %v2970_v4 = vld [vmem:[%s6255_s13 + $0xd0] sm:$0xff] }
 0xf32   : > { %v4798_v62 = vpack.c.bf16 %v2967_v59, %v2965_v49 }
 0xf33   : > { %4308 = vmatprep.mubr.msk.f32.mxu0 %vm972_vm2, %v2722_v5  ;;  %v2973_v5 = vld [vmem:[%s6255_s13 + $0xe8] sm:$0xff] }
 0xf34   : > { %4309 = vmatmul.mubr.msk.f32.vlgmr.msra.gmra.mrb[24].mxu0 %vm972_vm2, %v2723_v6  ;;  %v2975_v6 = vld [vmem:[%s6255_s13 + $0xf8] sm:$0xff] }
 0xf35   : > { %4773 = vmatpush3.bf16.msra.mxu0 %v4770_v28  ;;  %v2969_v28 = vld [vmem:[%s6255_s13 + $0xc8] sm:$0xff] }
 0xf36   : > { %4775 = vmatprep.subr.bf16.mxu0 %v4774_v7  ;;  %v4802_v2 = vpack.c.bf16 %v2971_v35, %v2969_v28  ;;  %v3482_v35 = vld [vmem:[%s6253_s11] ss:$0 sm:$0xff] }
 0xf39   : > { %4777 = vmatpush3.bf16.msra.mxu0 %v4774_v7  ;;  %v4804_v7 = vpack.c.bf16 %v2970_v4, %v2968_v3  ;;  %v3483_v3 = vld [vmem:[%s6254_s12] ss:$0 sm:$0xff] }
 0xf3a   : > { %4779 = vmatprep.subr.bf16.mxu0 %v4778_v31  ;;  %v4814_v31 = vpack.c.bf16 %v3088_v27, %v3087_v24  ;;  %v2976_v24 = vld [vmem:[%s6256_s14] sm:$0x3] }
0x1007   : > { %v4310_v8 = vpop.f32.mrb[24].mxu0 }
0x1008   : > { %v2796_v10 = vpop.f32.mrb[25].mxu0 }
0x1009   : > { %4319 = vmatprep.mubr.msk.f32.mxu0 %vm884_vm0, %v2796_v10  ;;  %v2972_v10 = vld [vmem:[%s6255_s13 + $0xe0] sm:$0xff] }
0x100a   : > { %4320 = vmatmul.mubr.msk.f32.vlgmr.msra.gmra.mrb[12].mxu0 %vm884_vm0, %v4310_v8  ;;  %v4806_v8 = vpack.c.bf16 %v2975_v6, %v2973_v5 }
0x100b   : > { %4781 = vmatpush1.bf16.msra.mxu0 %v4780_v36  ;;  %3052 = vmatprep.mubr.f32.mxu0 %v4996_v0  ;;  %v3090_v36 = vld [vmem:[%s6257_s15 + $0xa8] sm:$0xff] }
0x100c   : > { %4783 = vmatprep.subr.bf16.mxu0 %v4782_v37  ;;  %v4816_v37 = vpack.c.bf16 %v3072_v34, %v3071_v32  ;;  %v4818_v9 = vpack.c.bf16 %v3090_v36, %v3089_v33 }
0x100f   : > { %4785 = vmatpush1.bf16.msra.mxu0 %v4784_v41  ;;  %v3092_v41 = vld [vmem:[%s6257_s15 + $0xb8] sm:$0xff] }
0x1010   : > { %4787 = vmatprep.subr.bf16.mxu0 %v4786_v16  ;;  %v4820_v16 = vpack.c.bf16 %v3074_v39, %v3073_v38  ;;  %v4822_v19 = vpack.c.bf16 %v3092_v41, %v3091_v40 }
0x1013   : > { %4789 = vmatpush1.bf16.msra.mxu0 %v4788_v44  ;;  %v3076_v44 = vld [vmem:[%s6257_s15 + $0x38] sm:$0xff] }
0x1014   : > { %4791 = vmatprep.subr.bf16.mxu0 %v4790_v43 }
0x1017   : > { %4793 = vmatpush1.bf16.msra.mxu0 %v4792_v25  ;;  %v3080_v25 = vld [vmem:[%s6257_s15 + $0x58] sm:$0xff] }
0x1018   : > { %4795 = vmatprep.subr.bf16.mxu0 %v4794_v45  ;;  %v4832_v45 = vpack.c.bf16 %v3080_v25, %v3079_v29 }
0x101b   : > { %4797 = vmatpush1.bf16.msra.mxu0 %v4796_v60 }
0x101c   : > { %4799 = vmatprep.subr.bf16.mxu0 %v4798_v62 }
0x101f   : > { %4801 = vmatpush1.bf16.msra.mxu0 %v4800_v1 }
0x1020   : > { %4803 = vmatprep.subr.bf16.mxu0 %v4802_v2 }
0x1023   : > { %4805 = vmatpush1.bf16.msra.mxu0 %v4804_v7 }
0x1024   : > { %4807 = vmatprep.subr.bf16.mxu0 %v4806_v8  ;;  %v3081_v8 = vld [vmem:[%s6257_s15 + $0x60] sm:$0xff] }
0x10dd   : > { %v4321_v11 = vpop.f32.mrb[12].mxu0 }
0x10de   : > { %v2894_v15 = vadd.f32 %v4930_v13, %v4321_v11  ;;  %v2882_v17 = vpop.f32.mrb[13].mxu0  ;;  %v2974_v11 = vld [vmem:[%s6255_s13 + $0xf0] sm:$0xff]  ;;  %v3085_v13 = vld [vmem:[%s6257_s15 + $0x80] sm:$0xff] }
0x10df   : > { %v2893_v21 = vadd.f32 %v4931_v20, %v2882_v17  ;;  %v3069_v17 = vld [vmem:[%s6257_s15] sm:$0xff] }
0x10e0   : > { %v5966_v22 = vadd.f32 %v3481_v12, %v2894_v15  ;;  %v3086_v15 = vld [vmem:[%s6257_s15 + $0x88] sm:$0xff] }
0x10e1   : > { %v5968_v23 = vadd.f32 %v3481_v12, %v2893_v21  ;;  %v4808_v12 = vpack.c.bf16 %v2974_v11, %v2972_v10  ;;  %v4810_v20 = vpack.c.bf16 %v3086_v15, %v3085_v13  ;;  %v3070_v21 = vld [vmem:[%s6257_s15 + $0x8] sm:$0xff]  ;;  %v3099_v10 = vld [vmem:[%s6257_s15 + $0xf0] sm:$0xff]  ;;  %v3084_v13 = vld [vmem:[%s6257_s15 + $0x78] sm:$0xff] }
0x10e2   : > { %2906 = vadd.xlane.f32.xlu1 %v5966_v22  ;;  %v4812_v30 = vpack.c.bf16 %v3070_v21, %v3069_v17  ;;  %v2978_v17 = vlaneseq }
0x10e3   : > { %2904 = vadd.xlane.f32.xlu0 %v5968_v23  ;;  %4809 = vmatpush1.bf16.msra.mxu0 %v4808_v12  ;;  %v3083_v12 = vld [vmem:[%s6257_s15 + $0x70] sm:$0xff] }
0x10e4   : > { %4811 = vmatprep.subr.bf16.mxu1 %v4810_v20  ;;  %v4840_v15 = vpack.c.bf16 %v3084_v13, %v3083_v12  ;;  %v2979_v20 = vshrl.u32 %v2978_v17, 7 }
0x10e5   : > { %4813 = vmatpush3.bf16.msra.mxu1 %v4812_v30 }
0x10e6   : > { %4815 = vmatprep.subr.bf16.mxu1 %v4814_v31  ;;  %v2980_v21 = vsub.s32 0, %v2979_v20  ;;  %v2984_v27 = vsub.s32 1, %v2979_v20 }
0x10e8   : > { %v2981_v30 = vrot.slane %v2976_v24, %v2980_v21  ;;  %v2985_v31 = vrot.slane %v2976_v24, %v2984_v27 }
0x10e9   : > { %4817 = vmatpush3.bf16.msra.mxu1 %v4816_v37 }
0x10ea   : > { %4819 = vmatprep.subr.bf16.mxu1 %v4818_v9 }
0x10ed   : > { %4821 = vmatpush3.bf16.msra.mxu1 %v4820_v16 }
0x10ee   : > { %4823 = vmatprep.subr.bf16.mxu1 %v4822_v19 }
0x116f   : > { %v2907_v46 = vpop.xlane.xlu1 %2906 }
0x1170   : > { %v2909_v47 = vmul.f32 0.0078125, %v2907_v46  ;;  %v2905_v48 = vpop.xlane.xlu0 %2904  ;;  %v3093_v46 = vld [vmem:[%s6257_s15 + $0xc0] sm:$0xff] }
0x1171   : > { %v2908_v51 = vmul.f32 0.0078125, %v2905_v48  ;;  %v4824_v48 = vpack.c.bf16 %v3076_v44, %v3075_v42  ;;  %v3484_v44 = vld [vmem:[%s6258_s16] ss:$0 sm:$0xff] }
0x1172   : > { %v6009_v52 = vsub.f32 %v5966_v22, %v2909_v47  ;;  %v3094_v47 = vld [vmem:[%s6257_s15 + $0xc8] sm:$0xff] }
0x1173   : > { %v6012_v53 = vsub.f32 %v5968_v23, %v2908_v51  ;;  %v4826_v51 = vpack.c.bf16 %v3094_v47, %v3093_v46  ;;  %4825 = vmatpush3.bf16.msra.mxu1 %v4824_v48 }
0x1174   : > { %v2913_v54 = vmul.f32 %v6009_v52, %v6009_v52 }
0x1175   : > { %v2912_v18 = vmul.f32 %v6012_v53, %v6012_v53  ;;  %4827 = vmatprep.subr.bf16.mxu1 %v4826_v51 }
0x1176   : > { %2916 = vadd.xlane.f32.xlu1 %v2913_v54  ;;  %v3077_v54 = vld [vmem:[%s6257_s15 + $0x40] sm:$0xff] }
0x1177   : > { %2914 = vadd.xlane.f32.xlu0 %v2912_v18  ;;  %v3078_v18 = vld [vmem:[%s6257_s15 + $0x48] sm:$0xff] }
0x1178   : > { %v4828_v43 = vpack.c.bf16 %v3078_v18, %v3077_v54 }
0x117a   : > { %4829 = vmatpush3.bf16.msra.mxu1 %v4828_v43 }
0x117b   : > { %4831 = vmatprep.subr.bf16.mxu1 %v4830_v50 }
0x117e   : > { %4833 = vmatpush3.bf16.msra.mxu1 %v4832_v45 }
0x117f   : > { %4835 = vmatprep.subr.bf16.mxu1 %v4834_v57 }
0x1203   : > { %v2917_v58 = vpop.xlane.xlu1 %2916 }
0x1204   : > { %v2919_v60 = vmul.f32 0.0078125, %v2917_v58  ;;  %v2915_v49 = vpop.xlane.xlu0 %2914 }
0x1205   : > { %v2918_v59 = vmul.f32 0.0078125, %v2915_v49 }
0x1206   : > { %v2921_v61 = vadd.f32 1e-05, %v2919_v60 }
0x1207   : > { %v2920_v62 = vadd.f32 1e-05, %v2918_v59 }
0x1208   : > { %4926 = vrsqrt.f32 %v2921_v61 }
0x1209   : > { %4928 = vrsqrt.f32 %v2920_v62 }
0x1212   : > { %v4927_v63 = vpop.eup %4926 }
0x1213   : > { %v4929_v28 = vpop.eup %4928  ;;  %v2925_v2 = vmul.f32 %v4927_v63, %v6009_v52  ;;  %v3082_v52 = vld [vmem:[%s6257_s15 + $0x68] sm:$0xff] }
0x1214   : > { %v2924_v1 = vmul.f32 %v4929_v28, %v6012_v53  ;;  %v4836_v53 = vpack.c.bf16 %v3082_v52, %v3081_v8 }
0x1215   : > { %v2934_v6 = vmul.f32 %v3482_v35, %v2925_v2 }
0x1216   : > { %v2933_v4 = vmul.f32 %v3482_v35, %v2924_v1  ;;  %4837 = vmatpush3.bf16.msra.mxu1 %v4836_v53 }
0x1217   : > { %v2943_v7 = vadd.f32 %v3483_v3, %v2934_v6 }
0x1218   : > { %v2942_v5 = vadd.f32 %v3483_v3, %v2933_v4 }
0x121a   : > { %3053 = vmatmul.mubr.f32.vlgmr.msra.gmra.mrb[26].mxu0 %v2942_v5 }
0x121b   : > { %3058 = vmatprep.mubr.f32.mxu0 %v4996_v0  ;;  %v3100_v0 = vld [vmem:[%s6257_s15 + $0xf8] sm:$0xff] }
0x121c   : > { %v4838_v11 = vpack.c.bf16 %v3100_v0, %v3099_v10 }
0x121e   : > { %3059 = vmatmul.mubr.f32.gmra.mrb[28].mxu0 %v2943_v7  ;;  %4839 = vmatprep.subr.bf16.mxu1 %v4838_v11 }
0x121f   : > { %4841 = vmatpush3.bf16.msra.mxu1 %v4840_v15 }
0x12ed   : > { %v3054_v32 = vpop.f32.mrb[26].mxu0 }
0x12ee   : > { %v3055_v34 = vadd.f32 %v3054_v32, %v2981_v30  ;;  %v3056_v33 = vpop.f32.mrb[27].mxu0 }
0x12ef   : > { %v3057_v36 = vadd.f32 %v3056_v33, %v2985_v31 }
0x12f0   : > { %v3065_v38 = vmax.f32 %v3055_v34, 0.0 }
0x12f1   : > { %v3066_v37 = vmax.f32 %v3057_v36, 0.0  ;;  %v3060_v9 = vpop.f32.mrb[28].mxu0 }
0x12f2   : > { %v3061_v39 = vadd.f32 %v3060_v9, %v2981_v30  ;;  %v3062_v40 = vpop.f32.mrb[29].mxu0 }
0x12f3   : > { %v3063_v41 = vadd.f32 %v3062_v40, %v2985_v31  ;;  %3172 = vmatprep.mubr.f32.mxu1 %v3066_v37 }
0x12f4   : > { %3173 = vmatmul.mubr.f32.vlgmr.msra.gmra.mrb[16].mxu1 %v3065_v38  ;;  %v3067_v19 = vmax.f32 %v3061_v39, 0.0 }
0x12f5   : > { %v3068_v16 = vmax.f32 %v3063_v41, 0.0 }
0x12f7   : > { %3177 = vmatprep.mubr.f32.mxu1 %v3068_v16 }
0x12f8   : > { %3178 = vmatmul.mubr.f32.gmra.mrb[18].mxu1 %v3067_v19 }
0x13c7   : > { %v3796_v42 = vpop.f32.mrb[16].mxu1 }
0x13c8   : > { %v3797_v46 = vpop.f32.mrb[17].mxu1 }
0x13c9   : > { %v3798_v47 = vadd.f32 %v3797_v46, %v3796_v42 }
0x13cb   : > { %v3175_v48 = vadd.f32 %v3798_v47, %v3484_v44  ;;  %v3799_v51 = vpop.f32.mrb[18].mxu1 }
0x13cc   : > { %v3800_v54 = vpop.f32.mrb[19].mxu1 }
0x13cd   : > { %v3183_v18 = vadd.f32 %v3175_v48, %v5968_v23  ;;  %v3801_v26 = vadd.f32 %v3800_v54, %v3799_v51 }
0x13cf   : > { %3185 = vst [vmem:[%s541_s18] sm:$0xff] %v3183_v18  ;;  %v3180_v14 = vadd.f32 %v3801_v26, %v3484_v44 }
0x13d1   : > { %v3184_v43 = vadd.f32 %v3180_v14, %v5966_v22 }
0x13d3   : > { %3186 = vst [vmem:[%s541_s18 + $0x8] sm:$0xff] %v3184_v43 }
0x13d4   : > { %4945 = shalt.err (!%p4942_p3)
}
0x13d5   : > { %s4946_s29 = scalar_lea.hbm %s6198_s21, 256  ;;  %s4950_s24 = scalar_lea.hbm %s6259_s17, 512 }
0x13d6   : > { %p4947_p4 = scmp.ne.s32.totalorder %s6198_s21, %s4946_s29  ;;  %p4951_p9 = scmp.lt.u32.totalorder %s6198_s21, %s6259_s17 }
0x13d7   : > { %p4952_p10 = scmp.lt.u32.totalorder %s4950_s24, %s4946_s29  ;;  %p4954_p12 = scmp.lt.u32.totalorder %s4946_s29, %s6198_s21 }
0x13d8   : > { %p4948_p7 = pnand %p4947_p4, %p5128_p5 }
0x13d9   : > { %p4953_p11 = por %p4952_p10, %p4951_p9 }
0x13da   : > { %p4949_p8 = pneg %p4948_p7 }
0x13db   : > { %p4955_p13 = por %p4954_p12, %p4953_p11 }
0x13dd   : > { %p4956_p0 = pnand %p4955_p13, %p4949_p8 }
0x13df   : > { %4959 = shalt.err (!%p4956_p0)
}
0x13e0   : > { %s4998_s23 = smov 128   ;;  %s4999_s28 = smov 8  }
0x13e1   : > { %4848 = dma.vmem_to_hbm [thread:$0]  (%p5128_p5), %s6193_s19, 256, %s6198_s21, %s6201_s22, %s4998_s23, %s4998_s23, %s4999_s28  }
0x13e2 PF: > { %s6280_s30 = sld [smem:[#allocation7_spill]]  ;;  %s6281_s26 = sld [smem:[#allocation5_spill]] }
0x13e8   : > { %p4854_p1 = scmp.ge.s32.totalorder %s6280_s30, 2  ;;  %s3216_s18 = sand.u32 1, %s6281_s26  }
0x13e9   : > { %s3217_s29 = scalar_lea.sflag [#allocation3], %s3216_s18 }
0x13ea   : > { %p4851_p2 = pnand %p4854_p1, %p5132_p6 }
0x13ec   : > { %4977 = dma.done.wait (!%p4851_p2), %s3217_s29, 256  }
0x13ed   : > { %4979 = vsyncadd (!%p4851_p2), %s3217_s29, 4294967040  ;;  %s6283_s27 = sld [smem:[#allocation8_spill]]  ;;  %s6284_s20 = sld [smem:[#allocation6_spill]] }
0x13ee   : > { %s6285_s26 = sld [smem:[#allocation9_spill]]  ;;  %s6286_s24 = smov %s4986_s25 }
0x13f3   : > { %p27_p3 = scmp.ge.s32.totalorder %s6283_s27, 4   ;;  %s6287_s25 = smov %s6284_s20 }
0x13f5   :  { %29 = sbr.rel (!%p27_p3) target bundleno = 6 (0x6), region = 144 }
0x13fc   :  { %3222 = vsyncpa [#allocation3], 1 }
0x13fd   :  { %3224 = vsyncpa [#allocation3 + $0x1], 1 }

</bundles_post_ra>
